<compile_context>
chip_gen: v7x
topology: tpu7x:2x2x1
jax: 0.10.0
libtpu: 0.0.40
codegen_flags: <defaults>
</compile_context>

<pallas_src>
import functools

import numpy as np

import jax
import jax.numpy as jnp
from jax.experimental import pallas as pl
from jax.experimental.pallas import tpu as pltpu


# ----------------------------------------------------------------------------
# Fused kernel
# ----------------------------------------------------------------------------
def residual_block_kernel(x_ref, masks_ref, w1_ref, w2_ref, p1_ref, p2_ref, o_ref,
                          *, H, W, C, G, eps, per_tap, mm_dtype):
    HW = H * W
    Cg = C // G
    inv_n = 1.0 / float(HW * Cg)

    x = x_ref[0]                                       # (C, HW) f32, lane axis = H*W

    def tap(z, t):
        """Shifted-neighbour image for kernel tap t = 3*dy+dx; out-of-bounds zeroed."""
        dy, dx = t // 3, t % 3
        off = (dy - 1) * W + (dx - 1)
        # roll: out[p] = in[(p + off) mod HW]; masks kill every wrapped / OOB position.
        r = z if off == 0 else pltpu.roll(z, shift=(-off) % HW, axis=1)
        if not (dy == 1 and dx == 1):                  # centre tap needs no mask
            r = r * masks_ref[t:t + 1, :]              # (1, HW) boundary mask, lane-bcast
        return r.astype(mm_dtype)                      # cast MXU operand only

    def conv3x3(z, w_ref):
        if per_tap:
            # Production path (C >= 128): 9 accumulating matmuls, K = C; the (9C, HW)
            # im2col buffer is never materialized.
            acc = jnp.dot(w_ref[0], tap(z, 0), preferred_element_type=jnp.float32)
            for t in range(1, 9):
                acc += jnp.dot(w_ref[t], tap(z, t), preferred_element_type=jnp.float32)
            return acc
        # Small-C path: single im2col matmul with K = 9C (per-tap K would underfill MXU).
        patches = jnp.concatenate([tap(z, t) for t in range(9)], axis=0)   # (9C, HW)
        return jnp.dot(w_ref[...], patches, preferred_element_type=jnp.float32)

    def gn_relu(y, p_ref):
        # y: (C, HW) f32 (conv bias already added).  One pass over the data.
        s = jnp.sum(y, axis=-1, keepdims=True)          # (C, 1) per-channel sums
        ss = jnp.sum(y * y, axis=-1, keepdims=True)     # (C, 1) per-channel sum-of-squares
        gam, bet = p_ref[1], p_ref[2]                   # (C, 1) each
        scales, shifts = [], []
        for gi in range(G):                             # static unroll over tiny (Cg,1) slices
            sl = slice(gi * Cg, (gi + 1) * Cg)
            mu = jnp.sum(s[sl, :]) * inv_n
            var = jnp.maximum(jnp.sum(ss[sl, :]) * inv_n - mu * mu, 0.0)
            inv_std = jax.lax.rsqrt(var + eps)
            sc = gam[sl, :] * inv_std                   # fold gamma * rsqrt into one scale
            scales.append(sc)
            shifts.append(bet[sl, :] - mu * sc)
        scale = scales[0] if G == 1 else jnp.concatenate(scales, axis=0)   # (C, 1)
        shift = shifts[0] if G == 1 else jnp.concatenate(shifts, axis=0)   # (C, 1)
        return jnp.maximum(y * scale + shift, 0.0)      # one fused per-channel MAD + ReLU

    y1 = gn_relu(conv3x3(x, w1_ref) + p1_ref[0], p1_ref)    # y1 never touches HBM
    y2 = gn_relu(conv3x3(y1, w2_ref) + p2_ref[0], p2_ref)
    o_ref[0] = jnp.maximum(x + y2, 0.0)                     # residual + ReLU, dense store


# ----------------------------------------------------------------------------
# Wrapper
# ----------------------------------------------------------------------------
def _make_tap_masks(H, W):
    """(9, H*W) f32: 1 where the (dy,dx) neighbour of each pixel is in-bounds."""
    h = np.arange(H).reshape(H, 1)
    w = np.arange(W).reshape(1, W)
    ms = []
    for dy in range(3):
        for dx in range(3):
            m = ((h + dy - 1 >= 0) & (h + dy - 1 < H) &
                 (w + dx - 1 >= 0) & (w + dx - 1 < W))
            ms.append(m.astype(np.float32).reshape(-1))
    return jnp.asarray(np.stack(ms, axis=0))


def residual_block_forward(x, params, *, eps=1e-5, matmul_dtype=jnp.float32):
    """ResidualBlock(in_planes=C, planes=C, norm_fn='group', stride=1).

    x: (B, C, H, W) float32 (PyTorch NCHW), weights OIHW.  Returns NCHW float32.
    matmul_dtype=jnp.bfloat16 uses the bf16-native MXU path (v6e/v7x); the epilogue
    (GroupNorm stats, affine, ReLU, residual) always stays f32.
    """
    B, C, H, W = x.shape
    HW = H * W
    G = max(C // 8, 1)                                   # torch: num_groups = planes // 8
    per_tap = C >= 128                                   # per-tap accumulation for big C

    x_flat = x.reshape(B, C, HW).astype(jnp.float32)     # free reshape, lane axis = HW
    masks = _make_tap_masks(H, W)                        # (9, HW) f32, VMEM-resident

    def pack_w(w):                                       # w: OIHW (C, C, 3, 3)
        w = w.astype(matmul_dtype)
        if per_tap:
            # (9, C, Cin): w9[t] = w[:, :, ky, kx], t = 3*ky + kx
            return jnp.transpose(w, (2, 3, 0, 1)).reshape(9, C, C)
        # (C, 9*Cin): tap-major, channel-minor -> matches im2col patch rows
        return jnp.transpose(w, (0, 2, 3, 1)).reshape(C, 9 * C)

    def pack_p(b, g, be):                                # (3, C, 1): full (C,1) loads
        return jnp.stack([b, g, be], axis=0).astype(jnp.float32).reshape(3, C, 1)

    w1, w2 = pack_w(params["w1"]), pack_w(params["w2"])
    p1 = pack_p(params["b1"], params["g1"], params["be1"])
    p2 = pack_p(params["b2"], params["g2"], params["be2"])

    w_block = (9, C, C) if per_tap else (C, 9 * C)
    w_map = (lambda b: (0, 0, 0)) if per_tap else (lambda b: (0, 0))
    const2 = lambda b: (0, 0)
    const3 = lambda b: (0, 0, 0)

    kern = functools.partial(residual_block_kernel, H=H, W=W, C=C, G=G, eps=eps,
                             per_tap=per_tap, mm_dtype=matmul_dtype)

    out = pl.pallas_call(
        kern,
        out_shape=jax.ShapeDtypeStruct((B, C, HW), jnp.float32),
        grid_spec=pltpu.PrefetchScalarGridSpec(
            num_scalar_prefetch=0,
            grid=(B,),                                   # one sample per step
            in_specs=[
                pl.BlockSpec((1, C, HW), lambda b: (b, 0, 0)),   # x
                pl.BlockSpec((9, HW), const2),                   # boundary masks (resident)
                pl.BlockSpec(w_block, w_map),                    # W1 (resident)
                pl.BlockSpec(w_block, w_map),                    # W2 (resident)
                pl.BlockSpec((3, C, 1), const3),                 # [b1, g1, be1]
                pl.BlockSpec((3, C, 1), const3),                 # [b2, g2, be2]
            ],
            out_specs=pl.BlockSpec((1, C, HW), lambda b: (b, 0, 0)),
        ),
        compiler_params=pltpu.CompilerParams(
            dimension_semantics=("parallel",),           # v7x megacore splits the batch
            vmem_limit_bytes=64 * 1024 * 1024,
        ),
    )(x_flat, masks, w1, w2, p1, p2)

    return out.reshape(B, C, H, W)


# ----------------------------------------------------------------------------
# Pure-JAX reference (full-f32 precision) for correctness checks
# ----------------------------------------------------------------------------
def _ref_forward(x, params, *, eps=1e-5):
    B, C, H, W = x.shape
    G = max(C // 8, 1)

    def conv(z, w, b):
        y = jax.lax.conv_general_dilated(
            z, w, window_strides=(1, 1), padding="SAME",
            dimension_numbers=("NCHW", "OIHW", "NCHW"),
            precision=jax.lax.Precision.HIGHEST)
        return y + b.reshape(1, C, 1, 1)

    def gn(y, gamma, beta):
        yg = y.reshape(B, G, C // G, H * W)
        mu = yg.mean(axis=(2, 3), keepdims=True)
        var = ((yg - mu) ** 2).mean(axis=(2, 3), keepdims=True)
        yn = ((yg - mu) * jax.lax.rsqrt(var + eps)).reshape(B, C, H, W)
        return yn * gamma.reshape(1, C, 1, 1) + beta.reshape(1, C, 1, 1)

    y = jax.nn.relu(gn(conv(x, params["w1"], params["b1"]), params["g1"], params["be1"]))
    y = jax.nn.relu(gn(conv(y, params["w2"], params["b2"]), params["g2"], params["be2"]))
    return jax.nn.relu(x + y)


# ----------------------------------------------------------------------------
# Main
# ----------------------------------------------------------------------------
def _check(B, C, H, W, seed, matmul_dtype, atol, rtol):
    key = jax.random.PRNGKey(seed)
    ks = jax.random.split(key, 9)
    params = {
        "w1":  0.1 * jax.random.normal(ks[0], (C, C, 3, 3), jnp.float32),  # OIHW
        "b1":  0.1 * jax.random.normal(ks[1], (C,), jnp.float32),
        "g1":  1.0 + 0.1 * jax.random.normal(ks[2], (C,), jnp.float32),
        "be1": 0.1 * jax.random.normal(ks[3], (C,), jnp.float32),
        "w2":  0.1 * jax.random.normal(ks[4], (C, C, 3, 3), jnp.float32),
        "b2":  0.1 * jax.random.normal(ks[5], (C,), jnp.float32),
        "g2":  1.0 + 0.1 * jax.random.normal(ks[6], (C,), jnp.float32),
        "be2": 0.1 * jax.random.normal(ks[7], (C,), jnp.float32),
    }
    x = jax.random.normal(ks[8], (B, C, H, W), jnp.float32)  # NCHW like PyTorch

    out = jax.block_until_ready(residual_block_forward(x, params, matmul_dtype=matmul_dtype))
    ref = jax.block_until_ready(_ref_forward(x, params))

    assert out.shape == (B, C, H, W)
    err = float(jnp.max(jnp.abs(out - ref)))
    assert jnp.allclose(out, ref, atol=atol, rtol=rtol), (C, str(matmul_dtype), err)


if __name__ == "__main__":
    # Tolerances are sized for the worst-case MXU matmul precision (bf16 operand passes);
    # structural bugs (tap order / roll direction / GN grouping) would produce O(1) errors.
    # Small config: B=2, C=16 (num_groups=2), 16x16 -> im2col K=9C path, f32 MXU operands.
    _check(B=2, C=16, H=16, W=16, seed=0, matmul_dtype=jnp.float32, atol=5e-2, rtol=5e-2)
    # Same config with bf16 MXU operands (v6e/v7x production setting), f32 epilogue.
    _check(B=2, C=16, H=16, W=16, seed=0, matmul_dtype=jnp.bfloat16, atol=5e-2, rtol=5e-2)
    # C >= 128 exercises the per-tap accumulating-matmul path (no (9C, HW) buffer).
    _check(B=1, C=128, H=16, W=16, seed=1, matmul_dtype=jnp.float32, atol=5e-2, rtol=5e-2)
    print("KERNEL_OK")
</pallas_src>

<mosaic_0001>
module attributes {stable_mosaic.version = 11 : i64} {
  func.func @residual_block_kernel(%arg0: i32, %arg1: memref<1x16x256xf32, #tpu.memory_space<vmem>>, %arg2: memref<9x256xf32, #tpu.memory_space<vmem>>, %arg3: memref<16x144xf32, #tpu.memory_space<vmem>>, %arg4: memref<16x144xf32, #tpu.memory_space<vmem>>, %arg5: memref<3x16x1xf32, #tpu.memory_space<vmem>>, %arg6: memref<3x16x1xf32, #tpu.memory_space<vmem>>, %arg7: memref<1x16x256xf32, #tpu.memory_space<vmem>>) attributes {dimension_semantics = [#tpu.dimension_semantics<parallel>], iteration_bounds = array<i64: 2>, scalar_prefetch = 0 : i64, scratch_operands = 0 : i64, tpu.core_type = #tpu.core_type<tc>, window_params = [{transform_indices = @transform_0, window_bounds = array<i64: 1, 16, 256>}, {pipeline_mode = #tpu.pipeline_mode<synchronous>, transform_indices = @transform_1, window_bounds = array<i64: 9, 256>}, {pipeline_mode = #tpu.pipeline_mode<synchronous>, transform_indices = @transform_2, window_bounds = array<i64: 16, 144>}, {pipeline_mode = #tpu.pipeline_mode<synchronous>, transform_indices = @transform_3, window_bounds = array<i64: 16, 144>}, {pipeline_mode = #tpu.pipeline_mode<synchronous>, transform_indices = @transform_4, window_bounds = array<i64: 3, 16, 1>}, {pipeline_mode = #tpu.pipeline_mode<synchronous>, transform_indices = @transform_5, window_bounds = array<i64: 3, 16, 1>}, {transform_indices = @transform_6, window_bounds = array<i64: 1, 16, 256>}]} {
    %c0 = arith.constant 0 : index
    %c0_0 = arith.constant 0 : index
    %c0_1 = arith.constant 0 : index
    %0 = vector.load %arg1[%c0, %c0_0, %c0_1] : memref<1x16x256xf32, #tpu.memory_space<vmem>>, vector<1x16x256xf32>
    %1 = vector.shape_cast %0 : vector<1x16x256xf32> to vector<16x256xf32>
    %c17_i32 = arith.constant 17 : i32
    %2 = tpu.dynamic_rotate %1 by %c17_i32 dim 1 : vector<16x256xf32>, i32 -> vector<16x256xf32>
    %c0_2 = arith.constant 0 : index
    %c0_3 = arith.constant 0 : index
    %3 = vector.load %arg2[%c0_2, %c0_3] : memref<9x256xf32, #tpu.memory_space<vmem>>, vector<1x256xf32>
    %4 = vector.broadcast %3 : vector<1x256xf32> to vector<16x256xf32>
    %5 = arith.mulf %2, %4 : vector<16x256xf32>
    %c16_i32 = arith.constant 16 : i32
    %6 = tpu.dynamic_rotate %1 by %c16_i32 dim 1 : vector<16x256xf32>, i32 -> vector<16x256xf32>
    %c1 = arith.constant 1 : index
    %c0_4 = arith.constant 0 : index
    %7 = vector.load %arg2[%c1, %c0_4] : memref<9x256xf32, #tpu.memory_space<vmem>>, vector<1x256xf32>
    %8 = vector.broadcast %7 : vector<1x256xf32> to vector<16x256xf32>
    %9 = arith.mulf %6, %8 : vector<16x256xf32>
    %c15_i32 = arith.constant 15 : i32
    %10 = tpu.dynamic_rotate %1 by %c15_i32 dim 1 : vector<16x256xf32>, i32 -> vector<16x256xf32>
    %c2 = arith.constant 2 : index
    %c0_5 = arith.constant 0 : index
    %11 = vector.load %arg2[%c2, %c0_5] : memref<9x256xf32, #tpu.memory_space<vmem>>, vector<1x256xf32>
    %12 = vector.broadcast %11 : vector<1x256xf32> to vector<16x256xf32>
    %13 = arith.mulf %10, %12 : vector<16x256xf32>
    %c1_i32 = arith.constant 1 : i32
    %14 = tpu.dynamic_rotate %1 by %c1_i32 dim 1 : vector<16x256xf32>, i32 -> vector<16x256xf32>
    %c3 = arith.constant 3 : index
    %c0_6 = arith.constant 0 : index
    %15 = vector.load %arg2[%c3, %c0_6] : memref<9x256xf32, #tpu.memory_space<vmem>>, vector<1x256xf32>
    %16 = vector.broadcast %15 : vector<1x256xf32> to vector<16x256xf32>
    %17 = arith.mulf %14, %16 : vector<16x256xf32>
    %c255_i32 = arith.constant 255 : i32
    %18 = tpu.dynamic_rotate %1 by %c255_i32 dim 1 : vector<16x256xf32>, i32 -> vector<16x256xf32>
    %c5 = arith.constant 5 : index
    %c0_7 = arith.constant 0 : index
    %19 = vector.load %arg2[%c5, %c0_7] : memref<9x256xf32, #tpu.memory_space<vmem>>, vector<1x256xf32>
    %20 = vector.broadcast %19 : vector<1x256xf32> to vector<16x256xf32>
    %21 = arith.mulf %18, %20 : vector<16x256xf32>
    %c241_i32 = arith.constant 241 : i32
    %22 = tpu.dynamic_rotate %1 by %c241_i32 dim 1 : vector<16x256xf32>, i32 -> vector<16x256xf32>
    %c6 = arith.constant 6 : index
    %c0_8 = arith.constant 0 : index
    %23 = vector.load %arg2[%c6, %c0_8] : memref<9x256xf32, #tpu.memory_space<vmem>>, vector<1x256xf32>
    %24 = vector.broadcast %23 : vector<1x256xf32> to vector<16x256xf32>
    %25 = arith.mulf %22, %24 : vector<16x256xf32>
    %c240_i32 = arith.constant 240 : i32
    %26 = tpu.dynamic_rotate %1 by %c240_i32 dim 1 : vector<16x256xf32>, i32 -> vector<16x256xf32>
    %c7 = arith.constant 7 : index
    %c0_9 = arith.constant 0 : index
    %27 = vector.load %arg2[%c7, %c0_9] : memref<9x256xf32, #tpu.memory_space<vmem>>, vector<1x256xf32>
    %28 = vector.broadcast %27 : vector<1x256xf32> to vector<16x256xf32>
    %29 = arith.mulf %26, %28 : vector<16x256xf32>
    %c239_i32 = arith.constant 239 : i32
    %30 = tpu.dynamic_rotate %1 by %c239_i32 dim 1 : vector<16x256xf32>, i32 -> vector<16x256xf32>
    %c8 = arith.constant 8 : index
    %c0_10 = arith.constant 0 : index
    %31 = vector.load %arg2[%c8, %c0_10] : memref<9x256xf32, #tpu.memory_space<vmem>>, vector<1x256xf32>
    %32 = vector.broadcast %31 : vector<1x256xf32> to vector<16x256xf32>
    %33 = arith.mulf %30, %32 : vector<16x256xf32>
    %34 = tpu.concatenate %5, %9, %13, %17, %1, %21, %25, %29, %33 in 0 : vector<16x256xf32>, vector<16x256xf32>, vector<16x256xf32>, vector<16x256xf32>, vector<16x256xf32>, vector<16x256xf32>, vector<16x256xf32>, vector<16x256xf32>, vector<16x256xf32> -> vector<144x256xf32>
    %c0_11 = arith.constant 0 : index
    %c0_12 = arith.constant 0 : index
    %35 = vector.load %arg3[%c0_11, %c0_12] : memref<16x144xf32, #tpu.memory_space<vmem>>, vector<16x144xf32>
    %cst = arith.constant dense<0.000000e+00> : vector<16x256xf32>
    %36 = tpu.matmul %35, %34, %cst {dimension_numbers = #tpu.dot_dimension_numbers<[1], [0], [0], [1], [0, 0, 1, 1], [], []>} : vector<16x144xf32>, vector<144x256xf32>, vector<16x256xf32> -> vector<16x256xf32>
    %c0_13 = arith.constant 0 : index
    %c0_14 = arith.constant 0 : index
    %c0_15 = arith.constant 0 : index
    %37 = vector.load %arg5[%c0_13, %c0_14, %c0_15] : memref<3x16x1xf32, #tpu.memory_space<vmem>>, vector<1x16x1xf32>
    %38 = vector.shape_cast %37 : vector<1x16x1xf32> to vector<16x1xf32>
    %39 = vector.broadcast %38 : vector<16x1xf32> to vector<16x256xf32>
    %40 = arith.addf %36, %39 : vector<16x256xf32>
    %cst_16 = arith.constant dense<0.000000e+00> : vector<16xf32>
    %41 = vector.multi_reduction <add>, %40, %cst_16 [1] : vector<16x256xf32> to vector<16xf32>
    %42 = vector.shape_cast %41 : vector<16xf32> to vector<16x1xf32>
    %43 = arith.mulf %40, %40 : vector<16x256xf32>
    %cst_17 = arith.constant dense<0.000000e+00> : vector<16xf32>
    %44 = vector.multi_reduction <add>, %43, %cst_17 [1] : vector<16x256xf32> to vector<16xf32>
    %45 = vector.shape_cast %44 : vector<16xf32> to vector<16x1xf32>
    %c1_18 = arith.constant 1 : index
    %c0_19 = arith.constant 0 : index
    %c0_20 = arith.constant 0 : index
    %46 = vector.load %arg5[%c1_18, %c0_19, %c0_20] : memref<3x16x1xf32, #tpu.memory_space<vmem>>, vector<1x16x1xf32>
    %47 = vector.shape_cast %46 : vector<1x16x1xf32> to vector<16x1xf32>
    %c2_21 = arith.constant 2 : index
    %c0_22 = arith.constant 0 : index
    %c0_23 = arith.constant 0 : index
    %48 = vector.load %arg5[%c2_21, %c0_22, %c0_23] : memref<3x16x1xf32, #tpu.memory_space<vmem>>, vector<1x16x1xf32>
    %49 = vector.shape_cast %48 : vector<1x16x1xf32> to vector<16x1xf32>
    %50 = vector.extract_strided_slice %42 {offsets = [0, 0], sizes = [8, 1], strides = [1, 1]} : vector<16x1xf32> to vector<8x1xf32>
    %51 = vector.shape_cast %50 : vector<8x1xf32> to vector<1x8x1xf32>
    %cst_24 = arith.constant dense<0.000000e+00> : vector<1xf32>
    %52 = vector.multi_reduction <add>, %51, %cst_24 [1, 2] : vector<1x8x1xf32> to vector<1xf32>
    %53 = vector.shape_cast %52 : vector<1xf32> to vector<1x1x1xf32>
    %54 = vector.extract %53[0, 0, 0] : f32 from vector<1x1x1xf32>
    %cst_25 = arith.constant 4.8828125E-4 : f32
    %55 = arith.mulf %54, %cst_25 : f32
    %56 = vector.extract_strided_slice %45 {offsets = [0, 0], sizes = [8, 1], strides = [1, 1]} : vector<16x1xf32> to vector<8x1xf32>
    %57 = vector.shape_cast %56 : vector<8x1xf32> to vector<1x8x1xf32>
    %cst_26 = arith.constant dense<0.000000e+00> : vector<1xf32>
    %58 = vector.multi_reduction <add>, %57, %cst_26 [1, 2] : vector<1x8x1xf32> to vector<1xf32>
    %59 = vector.shape_cast %58 : vector<1xf32> to vector<1x1x1xf32>
    %60 = vector.extract %59[0, 0, 0] : f32 from vector<1x1x1xf32>
    %cst_27 = arith.constant 4.8828125E-4 : f32
    %61 = arith.mulf %60, %cst_27 : f32
    %62 = arith.mulf %55, %55 : f32
    %63 = arith.subf %61, %62 : f32
    %cst_28 = arith.constant 0.000000e+00 : f32
    %64 = arith.maximumf %63, %cst_28 : f32
    %cst_29 = arith.constant 9.99999974E-6 : f32
    %65 = arith.addf %64, %cst_29 : f32
    %66 = math.rsqrt %65 : f32
    %67 = vector.extract_strided_slice %47 {offsets = [0, 0], sizes = [8, 1], strides = [1, 1]} : vector<16x1xf32> to vector<8x1xf32>
    %68 = vector.broadcast %66 : f32 to vector<8x1xf32>
    %69 = arith.mulf %67, %68 : vector<8x1xf32>
    %70 = vector.extract_strided_slice %49 {offsets = [0, 0], sizes = [8, 1], strides = [1, 1]} : vector<16x1xf32> to vector<8x1xf32>
    %71 = vector.broadcast %55 : f32 to vector<8x1xf32>
    %72 = arith.mulf %71, %69 : vector<8x1xf32>
    %73 = arith.subf %70, %72 : vector<8x1xf32>
    %74 = vector.extract_strided_slice %42 {offsets = [8, 0], sizes = [8, 1], strides = [1, 1]} : vector<16x1xf32> to vector<8x1xf32>
    %75 = vector.shape_cast %74 : vector<8x1xf32> to vector<1x8x1xf32>
    %cst_30 = arith.constant dense<0.000000e+00> : vector<1xf32>
    %76 = vector.multi_reduction <add>, %75, %cst_30 [1, 2] : vector<1x8x1xf32> to vector<1xf32>
    %77 = vector.shape_cast %76 : vector<1xf32> to vector<1x1x1xf32>
    %78 = vector.extract %77[0, 0, 0] : f32 from vector<1x1x1xf32>
    %cst_31 = arith.constant 4.8828125E-4 : f32
    %79 = arith.mulf %78, %cst_31 : f32
    %80 = vector.extract_strided_slice %45 {offsets = [8, 0], sizes = [8, 1], strides = [1, 1]} : vector<16x1xf32> to vector<8x1xf32>
    %81 = vector.shape_cast %80 : vector<8x1xf32> to vector<1x8x1xf32>
    %cst_32 = arith.constant dense<0.000000e+00> : vector<1xf32>
    %82 = vector.multi_reduction <add>, %81, %cst_32 [1, 2] : vector<1x8x1xf32> to vector<1xf32>
    %83 = vector.shape_cast %82 : vector<1xf32> to vector<1x1x1xf32>
    %84 = vector.extract %83[0, 0, 0] : f32 from vector<1x1x1xf32>
    %cst_33 = arith.constant 4.8828125E-4 : f32
    %85 = arith.mulf %84, %cst_33 : f32
    %86 = arith.mulf %79, %79 : f32
    %87 = arith.subf %85, %86 : f32
    %cst_34 = arith.constant 0.000000e+00 : f32
    %88 = arith.maximumf %87, %cst_34 : f32
    %cst_35 = arith.constant 9.99999974E-6 : f32
    %89 = arith.addf %88, %cst_35 : f32
    %90 = math.rsqrt %89 : f32
    %91 = vector.extract_strided_slice %47 {offsets = [8, 0], sizes = [8, 1], strides = [1, 1]} : vector<16x1xf32> to vector<8x1xf32>
    %92 = vector.broadcast %90 : f32 to vector<8x1xf32>
    %93 = arith.mulf %91, %92 : vector<8x1xf32>
    %94 = vector.extract_strided_slice %49 {offsets = [8, 0], sizes = [8, 1], strides = [1, 1]} : vector<16x1xf32> to vector<8x1xf32>
    %95 = vector.broadcast %79 : f32 to vector<8x1xf32>
    %96 = arith.mulf %95, %93 : vector<8x1xf32>
    %97 = arith.subf %94, %96 : vector<8x1xf32>
    %98 = tpu.concatenate %69, %93 in 0 : vector<8x1xf32>, vector<8x1xf32> -> vector<16x1xf32>
    %99 = tpu.concatenate %73, %97 in 0 : vector<8x1xf32>, vector<8x1xf32> -> vector<16x1xf32>
    %100 = vector.broadcast %98 : vector<16x1xf32> to vector<16x256xf32>
    %101 = arith.mulf %40, %100 : vector<16x256xf32>
    %102 = vector.broadcast %99 : vector<16x1xf32> to vector<16x256xf32>
    %103 = arith.addf %101, %102 : vector<16x256xf32>
    %cst_36 = arith.constant 0.000000e+00 : f32
    %104 = vector.broadcast %cst_36 : f32 to vector<16x256xf32>
    %105 = arith.maximumf %103, %104 : vector<16x256xf32>
    %c17_i32_37 = arith.constant 17 : i32
    %106 = tpu.dynamic_rotate %105 by %c17_i32_37 dim 1 : vector<16x256xf32>, i32 -> vector<16x256xf32>
    %c0_38 = arith.constant 0 : index
    %c0_39 = arith.constant 0 : index
    %107 = vector.load %arg2[%c0_38, %c0_39] : memref<9x256xf32, #tpu.memory_space<vmem>>, vector<1x256xf32>
    %108 = vector.broadcast %107 : vector<1x256xf32> to vector<16x256xf32>
    %109 = arith.mulf %106, %108 : vector<16x256xf32>
    %c16_i32_40 = arith.constant 16 : i32
    %110 = tpu.dynamic_rotate %105 by %c16_i32_40 dim 1 : vector<16x256xf32>, i32 -> vector<16x256xf32>
    %c1_41 = arith.constant 1 : index
    %c0_42 = arith.constant 0 : index
    %111 = vector.load %arg2[%c1_41, %c0_42] : memref<9x256xf32, #tpu.memory_space<vmem>>, vector<1x256xf32>
    %112 = vector.broadcast %111 : vector<1x256xf32> to vector<16x256xf32>
    %113 = arith.mulf %110, %112 : vector<16x256xf32>
    %c15_i32_43 = arith.constant 15 : i32
    %114 = tpu.dynamic_rotate %105 by %c15_i32_43 dim 1 : vector<16x256xf32>, i32 -> vector<16x256xf32>
    %c2_44 = arith.constant 2 : index
    %c0_45 = arith.constant 0 : index
    %115 = vector.load %arg2[%c2_44, %c0_45] : memref<9x256xf32, #tpu.memory_space<vmem>>, vector<1x256xf32>
    %116 = vector.broadcast %115 : vector<1x256xf32> to vector<16x256xf32>
    %117 = arith.mulf %114, %116 : vector<16x256xf32>
    %c1_i32_46 = arith.constant 1 : i32
    %118 = tpu.dynamic_rotate %105 by %c1_i32_46 dim 1 : vector<16x256xf32>, i32 -> vector<16x256xf32>
    %c3_47 = arith.constant 3 : index
    %c0_48 = arith.constant 0 : index
    %119 = vector.load %arg2[%c3_47, %c0_48] : memref<9x256xf32, #tpu.memory_space<vmem>>, vector<1x256xf32>
    %120 = vector.broadcast %119 : vector<1x256xf32> to vector<16x256xf32>
    %121 = arith.mulf %118, %120 : vector<16x256xf32>
    %c255_i32_49 = arith.constant 255 : i32
    %122 = tpu.dynamic_rotate %105 by %c255_i32_49 dim 1 : vector<16x256xf32>, i32 -> vector<16x256xf32>
    %c5_50 = arith.constant 5 : index
    %c0_51 = arith.constant 0 : index
    %123 = vector.load %arg2[%c5_50, %c0_51] : memref<9x256xf32, #tpu.memory_space<vmem>>, vector<1x256xf32>
    %124 = vector.broadcast %123 : vector<1x256xf32> to vector<16x256xf32>
    %125 = arith.mulf %122, %124 : vector<16x256xf32>
    %c241_i32_52 = arith.constant 241 : i32
    %126 = tpu.dynamic_rotate %105 by %c241_i32_52 dim 1 : vector<16x256xf32>, i32 -> vector<16x256xf32>
    %c6_53 = arith.constant 6 : index
    %c0_54 = arith.constant 0 : index
    %127 = vector.load %arg2[%c6_53, %c0_54] : memref<9x256xf32, #tpu.memory_space<vmem>>, vector<1x256xf32>
    %128 = vector.broadcast %127 : vector<1x256xf32> to vector<16x256xf32>
    %129 = arith.mulf %126, %128 : vector<16x256xf32>
    %c240_i32_55 = arith.constant 240 : i32
    %130 = tpu.dynamic_rotate %105 by %c240_i32_55 dim 1 : vector<16x256xf32>, i32 -> vector<16x256xf32>
    %c7_56 = arith.constant 7 : index
    %c0_57 = arith.constant 0 : index
    %131 = vector.load %arg2[%c7_56, %c0_57] : memref<9x256xf32, #tpu.memory_space<vmem>>, vector<1x256xf32>
    %132 = vector.broadcast %131 : vector<1x256xf32> to vector<16x256xf32>
    %133 = arith.mulf %130, %132 : vector<16x256xf32>
    %c239_i32_58 = arith.constant 239 : i32
    %134 = tpu.dynamic_rotate %105 by %c239_i32_58 dim 1 : vector<16x256xf32>, i32 -> vector<16x256xf32>
    %c8_59 = arith.constant 8 : index
    %c0_60 = arith.constant 0 : index
    %135 = vector.load %arg2[%c8_59, %c0_60] : memref<9x256xf32, #tpu.memory_space<vmem>>, vector<1x256xf32>
    %136 = vector.broadcast %135 : vector<1x256xf32> to vector<16x256xf32>
    %137 = arith.mulf %134, %136 : vector<16x256xf32>
    %138 = tpu.concatenate %109, %113, %117, %121, %105, %125, %129, %133, %137 in 0 : vector<16x256xf32>, vector<16x256xf32>, vector<16x256xf32>, vector<16x256xf32>, vector<16x256xf32>, vector<16x256xf32>, vector<16x256xf32>, vector<16x256xf32>, vector<16x256xf32> -> vector<144x256xf32>
    %c0_61 = arith.constant 0 : index
    %c0_62 = arith.constant 0 : index
    %139 = vector.load %arg4[%c0_61, %c0_62] : memref<16x144xf32, #tpu.memory_space<vmem>>, vector<16x144xf32>
    %cst_63 = arith.constant dense<0.000000e+00> : vector<16x256xf32>
    %140 = tpu.matmul %139, %138, %cst_63 {dimension_numbers = #tpu.dot_dimension_numbers<[1], [0], [0], [1], [0, 0, 1, 1], [], []>} : vector<16x144xf32>, vector<144x256xf32>, vector<16x256xf32> -> vector<16x256xf32>
    %c0_64 = arith.constant 0 : index
    %c0_65 = arith.constant 0 : index
    %c0_66 = arith.constant 0 : index
    %141 = vector.load %arg6[%c0_64, %c0_65, %c0_66] : memref<3x16x1xf32, #tpu.memory_space<vmem>>, vector<1x16x1xf32>
    %142 = vector.shape_cast %141 : vector<1x16x1xf32> to vector<16x1xf32>
    %143 = vector.broadcast %142 : vector<16x1xf32> to vector<16x256xf32>
    %144 = arith.addf %140, %143 : vector<16x256xf32>
    %cst_67 = arith.constant dense<0.000000e+00> : vector<16xf32>
    %145 = vector.multi_reduction <add>, %144, %cst_67 [1] : vector<16x256xf32> to vector<16xf32>
    %146 = vector.shape_cast %145 : vector<16xf32> to vector<16x1xf32>
    %147 = arith.mulf %144, %144 : vector<16x256xf32>
    %cst_68 = arith.constant dense<0.000000e+00> : vector<16xf32>
    %148 = vector.multi_reduction <add>, %147, %cst_68 [1] : vector<16x256xf32> to vector<16xf32>
    %149 = vector.shape_cast %148 : vector<16xf32> to vector<16x1xf32>
    %c1_69 = arith.constant 1 : index
    %c0_70 = arith.constant 0 : index
    %c0_71 = arith.constant 0 : index
    %150 = vector.load %arg6[%c1_69, %c0_70, %c0_71] : memref<3x16x1xf32, #tpu.memory_space<vmem>>, vector<1x16x1xf32>
    %151 = vector.shape_cast %150 : vector<1x16x1xf32> to vector<16x1xf32>
    %c2_72 = arith.constant 2 : index
    %c0_73 = arith.constant 0 : index
    %c0_74 = arith.constant 0 : index
    %152 = vector.load %arg6[%c2_72, %c0_73, %c0_74] : memref<3x16x1xf32, #tpu.memory_space<vmem>>, vector<1x16x1xf32>
    %153 = vector.shape_cast %152 : vector<1x16x1xf32> to vector<16x1xf32>
    %154 = vector.extract_strided_slice %146 {offsets = [0, 0], sizes = [8, 1], strides = [1, 1]} : vector<16x1xf32> to vector<8x1xf32>
    %155 = vector.shape_cast %154 : vector<8x1xf32> to vector<1x8x1xf32>
    %cst_75 = arith.constant dense<0.000000e+00> : vector<1xf32>
    %156 = vector.multi_reduction <add>, %155, %cst_75 [1, 2] : vector<1x8x1xf32> to vector<1xf32>
    %157 = vector.shape_cast %156 : vector<1xf32> to vector<1x1x1xf32>
    %158 = vector.extract %157[0, 0, 0] : f32 from vector<1x1x1xf32>
    %cst_76 = arith.constant 4.8828125E-4 : f32
    %159 = arith.mulf %158, %cst_76 : f32
    %160 = vector.extract_strided_slice %149 {offsets = [0, 0], sizes = [8, 1], strides = [1, 1]} : vector<16x1xf32> to vector<8x1xf32>
    %161 = vector.shape_cast %160 : vector<8x1xf32> to vector<1x8x1xf32>
    %cst_77 = arith.constant dense<0.000000e+00> : vector<1xf32>
    %162 = vector.multi_reduction <add>, %161, %cst_77 [1, 2] : vector<1x8x1xf32> to vector<1xf32>
    %163 = vector.shape_cast %162 : vector<1xf32> to vector<1x1x1xf32>
    %164 = vector.extract %163[0, 0, 0] : f32 from vector<1x1x1xf32>
    %cst_78 = arith.constant 4.8828125E-4 : f32
    %165 = arith.mulf %164, %cst_78 : f32
    %166 = arith.mulf %159, %159 : f32
    %167 = arith.subf %165, %166 : f32
    %cst_79 = arith.constant 0.000000e+00 : f32
    %168 = arith.maximumf %167, %cst_79 : f32
    %cst_80 = arith.constant 9.99999974E-6 : f32
    %169 = arith.addf %168, %cst_80 : f32
    %170 = math.rsqrt %169 : f32
    %171 = vector.extract_strided_slice %151 {offsets = [0, 0], sizes = [8, 1], strides = [1, 1]} : vector<16x1xf32> to vector<8x1xf32>
    %172 = vector.broadcast %170 : f32 to vector<8x1xf32>
    %173 = arith.mulf %171, %172 : vector<8x1xf32>
    %174 = vector.extract_strided_slice %153 {offsets = [0, 0], sizes = [8, 1], strides = [1, 1]} : vector<16x1xf32> to vector<8x1xf32>
    %175 = vector.broadcast %159 : f32 to vector<8x1xf32>
    %176 = arith.mulf %175, %173 : vector<8x1xf32>
    %177 = arith.subf %174, %176 : vector<8x1xf32>
    %178 = vector.extract_strided_slice %146 {offsets = [8, 0], sizes = [8, 1], strides = [1, 1]} : vector<16x1xf32> to vector<8x1xf32>
    %179 = vector.shape_cast %178 : vector<8x1xf32> to vector<1x8x1xf32>
    %cst_81 = arith.constant dense<0.000000e+00> : vector<1xf32>
    %180 = vector.multi_reduction <add>, %179, %cst_81 [1, 2] : vector<1x8x1xf32> to vector<1xf32>
    %181 = vector.shape_cast %180 : vector<1xf32> to vector<1x1x1xf32>
    %182 = vector.extract %181[0, 0, 0] : f32 from vector<1x1x1xf32>
    %cst_82 = arith.constant 4.8828125E-4 : f32
    %183 = arith.mulf %182, %cst_82 : f32
    %184 = vector.extract_strided_slice %149 {offsets = [8, 0], sizes = [8, 1], strides = [1, 1]} : vector<16x1xf32> to vector<8x1xf32>
    %185 = vector.shape_cast %184 : vector<8x1xf32> to vector<1x8x1xf32>
    %cst_83 = arith.constant dense<0.000000e+00> : vector<1xf32>
    %186 = vector.multi_reduction <add>, %185, %cst_83 [1, 2] : vector<1x8x1xf32> to vector<1xf32>
    %187 = vector.shape_cast %186 : vector<1xf32> to vector<1x1x1xf32>
    %188 = vector.extract %187[0, 0, 0] : f32 from vector<1x1x1xf32>
    %cst_84 = arith.constant 4.8828125E-4 : f32
    %189 = arith.mulf %188, %cst_84 : f32
    %190 = arith.mulf %183, %183 : f32
    %191 = arith.subf %189, %190 : f32
    %cst_85 = arith.constant 0.000000e+00 : f32
    %192 = arith.maximumf %191, %cst_85 : f32
    %cst_86 = arith.constant 9.99999974E-6 : f32
    %193 = arith.addf %192, %cst_86 : f32
    %194 = math.rsqrt %193 : f32
    %195 = vector.extract_strided_slice %151 {offsets = [8, 0], sizes = [8, 1], strides = [1, 1]} : vector<16x1xf32> to vector<8x1xf32>
    %196 = vector.broadcast %194 : f32 to vector<8x1xf32>
    %197 = arith.mulf %195, %196 : vector<8x1xf32>
    %198 = vector.extract_strided_slice %153 {offsets = [8, 0], sizes = [8, 1], strides = [1, 1]} : vector<16x1xf32> to vector<8x1xf32>
    %199 = vector.broadcast %183 : f32 to vector<8x1xf32>
    %200 = arith.mulf %199, %197 : vector<8x1xf32>
    %201 = arith.subf %198, %200 : vector<8x1xf32>
    %202 = tpu.concatenate %173, %197 in 0 : vector<8x1xf32>, vector<8x1xf32> -> vector<16x1xf32>
    %203 = tpu.concatenate %177, %201 in 0 : vector<8x1xf32>, vector<8x1xf32> -> vector<16x1xf32>
    %204 = vector.broadcast %202 : vector<16x1xf32> to vector<16x256xf32>
    %205 = arith.mulf %144, %204 : vector<16x256xf32>
    %206 = vector.broadcast %203 : vector<16x1xf32> to vector<16x256xf32>
    %207 = arith.addf %205, %206 : vector<16x256xf32>
    %cst_87 = arith.constant 0.000000e+00 : f32
    %208 = vector.broadcast %cst_87 : f32 to vector<16x256xf32>
    %209 = arith.maximumf %207, %208 : vector<16x256xf32>
    %210 = arith.addf %1, %209 : vector<16x256xf32>
    %cst_88 = arith.constant 0.000000e+00 : f32
    %211 = vector.broadcast %cst_88 : f32 to vector<16x256xf32>
    %212 = arith.maximumf %210, %211 : vector<16x256xf32>
    %c0_89 = arith.constant 0 : index
    %c0_90 = arith.constant 0 : index
    %c0_91 = arith.constant 0 : index
    %213 = vector.load %arg7[%c0_89, %c0_90, %c0_91] : memref<1x16x256xf32, #tpu.memory_space<vmem>>, vector<1x16x256xf32>
    %214 = vector.shape_cast %213 : vector<1x16x256xf32> to vector<16x256xf32>
    %215 = vector.shape_cast %212 : vector<16x256xf32> to vector<1x16x256xf32>
    tpu.vector_store %arg7[%c0_89, %c0_90, %c0_91], %215 {strides = array<i32>} : memref<1x16x256xf32, #tpu.memory_space<vmem>>, vector<1x16x256xf32>,
    return
  }
  func.func @transform_0(%arg0: i32) -> (i32, i32, i32) {
    %c0_i32 = arith.constant 0 : i32
    %c0_i32_0 = arith.constant 0 : i32
    %c0_i32_1 = arith.constant 0 : i32
    return %arg0, %c0_i32, %c0_i32_0 : i32, i32, i32
  }
  func.func @transform_1(%arg0: i32) -> (i32, i32) {
    %c0_i32 = arith.constant 0 : i32
    %c0_i32_0 = arith.constant 0 : i32
    %c0_i32_1 = arith.constant 0 : i32
    return %c0_i32, %c0_i32_0 : i32, i32
  }
  func.func @transform_2(%arg0: i32) -> (i32, i32) {
    %c0_i32 = arith.constant 0 : i32
    %c0_i32_0 = arith.constant 0 : i32
    %c0_i32_1 = arith.constant 0 : i32
    return %c0_i32, %c0_i32_0 : i32, i32
  }
  func.func @transform_3(%arg0: i32) -> (i32, i32) {
    %c0_i32 = arith.constant 0 : i32
    %c0_i32_0 = arith.constant 0 : i32
    %c0_i32_1 = arith.constant 0 : i32
    return %c0_i32, %c0_i32_0 : i32, i32
  }
  func.func @transform_4(%arg0: i32) -> (i32, i32, i32) {
    %c0_i32 = arith.constant 0 : i32
    %c0_i32_0 = arith.constant 0 : i32
    %c0_i32_1 = arith.constant 0 : i32
    %c0_i32_2 = arith.constant 0 : i32
    return %c0_i32, %c0_i32_0, %c0_i32_1 : i32, i32, i32
  }
  func.func @transform_5(%arg0: i32) -> (i32, i32, i32) {
    %c0_i32 = arith.constant 0 : i32
    %c0_i32_0 = arith.constant 0 : i32
    %c0_i32_1 = arith.constant 0 : i32
    %c0_i32_2 = arith.constant 0 : i32
    return %c0_i32, %c0_i32_0, %c0_i32_1 : i32, i32, i32
  }
  func.func @transform_6(%arg0: i32) -> (i32, i32, i32) {
    %c0_i32 = arith.constant 0 : i32
    %c0_i32_0 = arith.constant 0 : i32
    %c0_i32_1 = arith.constant 0 : i32
    return %arg0, %c0_i32, %c0_i32_0 : i32, i32, i32
  }
}

</mosaic_0001>

<bundles_post_ra>
// kernel: tpu_custom_call.1
= control target key start
LH: loop header
LB: loop body
LE: loop exit
PB: predicated region body
PF: predicated region fallthrough
CT: control target
= control target key end

     0   :  { %11 = vsyncpa [#allocation3], 0  ;;  %s2680_s0 = inlined_call_operand.hbm [shape: f32[2,16,256], index: 0, kind: input, shape index: {}]   ;;  %s2681_s1 = inlined_call_operand.hbm [shape: f32[9,256], index: 1, kind: input, shape index: {}]   ;;  %s2682_s2 = inlined_call_operand.hbm [shape: f32[16,144], index: 2, kind: input, shape index: {}]   ;;  %s2683_s3 = inlined_call_operand.hbm [shape: f32[16,144], index: 3, kind: input, shape index: {}]   ;;  %s2684_s4 = inlined_call_operand.hbm [shape: f32[3,16,1], index: 4, kind: input, shape index: {}]   ;;  %s2685_s5 = inlined_call_operand.hbm [shape: f32[3,16,1], index: 5, kind: input, shape index: {}]   ;;  %s2686_s6 = inlined_call_operand.hbm [shape: f32[2,16,256], index: 6, kind: output, shape index: {}]  }
   0x1   :  { %13 = vsyncpa [#allocation3 + $0x1], 0 }
   0x2   :  { %14 = vsyncpa [#allocation6], 0 }
   0x3   :  { %15 = vsyncpa [#allocation9], 0 }
   0x4   :  { %16 = vsyncpa [#allocation12], 0 }
   0x5   :  { %17 = vsyncpa [#allocation4], 0 }
   0x6   :  { %19 = vsyncpa [#allocation4 + $0x1], 0  ;;  %s1866_s21 = smov 0   ;;  %s1868_s22 = smov 0  }
   0x7   :  { %s1870_s23 = smov 0   ;;  %s1872_s24 = smov 0  }
   0x8 LB: > { %s1809_s25 = smov [#allocation5]   ;;  %s1887_s27 = sadd.s32 4294967295, %s1807_s24   ;;  %s1807_s24 = sphi %s1872_s24, %s2734_s24   ;;  %s1803_s23 = sphi %s1870_s23, %s2733_s23   ;;  %s1799_s22 = sphi %s1868_s22, %s2732_s22   ;;  %s1795_s21 = sphi %s1866_s21, %s2731_s21  }
   0x9   : > { %s199_s26 = sshll.u32 %s1809_s25, 4  ;;  %p1308_p0 = scmp.ge.s32.totalorder %s1807_s24, 1  ;;  %s1892_s26 = int_to_ptr.vmem [resolvable:$true] %s199_s26 }
   0xa   : > { %p2687_p1 = scmp.eq.s32.totalorder %s1887_s27, 0  ;;  %p187_p2 = scmp.lt.s32.totalorder %s1807_s24, 3 }
   0xb   : > { %s1810_s29 = smov [#allocation8]   ;;  %s1811_s8 = smov [#allocation7]  }
   0xc   : > { %p1894_p3 = pnand %p1308_p0, %p187_p2  ;;  %s225_s30 = sshll.u32 %s1810_s29, 4  ;;  %s1907_s30 = int_to_ptr.vmem [resolvable:$true] %s225_s30 }
   0xd   : > { %s212_s9 = sshll.u32 %s1811_s8, 4  ;;  %s1559_s12 = scalar_lea.hbm %s2681_s1, 512  ;;  %s1909_s9 = int_to_ptr.vmem [resolvable:$true] %s212_s9 }
   0xe   : > { %s2705_s28 = scalar_select %p1894_p3, 1, 0 }
   0xf   : > { %p1457_p5 = pneg %p1894_p3  ;;  %p1560_p7 = scmp.ne.s32.totalorder %s2681_s1, %s1559_s12 }
  0x10   : > { %p1566_p11 = scmp.lt.u32.totalorder %s1559_s12, %s2681_s1 }
  0x11   : > { %p1903_p6 = pnand %p1457_p5, %p2687_p1 }
  0x13   : > { %p1919_p8 = pneg %p1903_p6 }
  0x15   : > { %p1562_p9 = pnand %p1919_p8, %p1560_p7 }
  0x17   : > { %p1563_p10 = pneg %p1562_p9 }
  0x19   : > { %p1568_p12 = pnand %p1566_p11, %p1563_p10 }
  0x1b   : > { %1571 = shalt.err (!%p1568_p12)
}
  0x1c   : > { %s1572_s18 = scalar_lea.vmem %s1892_s26, 512  ;;  %p1580_p5 = scmp.lt.s32.totalorder %s1892_s26, %s1892_s26 }
  0x1d   : > { %p1573_p13 = scmp.ne.s32.totalorder %s1892_s26, %s1572_s18  ;;  %p1581_p4 = scmp.lt.s32.totalorder %s1572_s18, %s1572_s18 }
  0x1f   : > { %p1575_p0 = pnand %p1573_p13, %p1919_p8  ;;  %p1582_p7 = por %p1581_p4, %p1580_p5 }
  0x21   : > { %p1576_p2 = pneg %p1575_p0 }
  0x23   : > { %p1583_p9 = pnand %p1582_p7, %p1576_p2 }
  0x25   : > { %1586 = shalt.err (!%p1583_p9)
}
  0x26   : > { %s1812_s19 = smov 256   ;;  %s1813_s20 = smov 16  }
  0x27   : > { %1460 = dma.hbm_to_vmem [thread:$0]  (!%p1903_p6), %s2681_s1, 512, %s1892_s26, [#allocation6], %s1812_s19, %s1812_s19, %s1813_s20  }
  0x28   : > { %s1587_s11 = scalar_lea.hbm %s2683_s3, 512 }
  0x29   : > { %p1588_p4 = scmp.ne.s32.totalorder %s2683_s3, %s1587_s11  ;;  %p1594_p12 = scmp.lt.u32.totalorder %s1587_s11, %s2683_s3 }
  0x2b   : > { %p1590_p10 = pnand %p1588_p4, %p1919_p8 }
  0x2d   : > { %p1591_p11 = pneg %p1590_p10 }
  0x2f   : > { %p1596_p13 = pnand %p1594_p12, %p1591_p11 }
  0x31   : > { %1599 = shalt.err (!%p1596_p13)
}
  0x32   : > { %s1600_s26 = scalar_lea.vmem %s1907_s30, 512  ;;  %p1608_p7 = scmp.lt.s32.totalorder %s1907_s30, %s1907_s30 }
  0x33   : > { %p1601_p0 = scmp.ne.s32.totalorder %s1907_s30, %s1600_s26  ;;  %p1609_p9 = scmp.lt.s32.totalorder %s1600_s26, %s1600_s26 }
  0x35   : > { %p1603_p2 = pnand %p1601_p0, %p1919_p8  ;;  %p1610_p4 = por %p1609_p9, %p1608_p7 }
  0x37   : > { %p1604_p5 = pneg %p1603_p2 }
  0x39   : > { %p1611_p10 = pnand %p1610_p4, %p1604_p5 }
  0x3b   : > { %1614 = shalt.err (!%p1611_p10)
}
  0x3c   : > { %1466 = dma.hbm_to_vmem [thread:$0]  (!%p1903_p6), %s2683_s3, 512, %s1907_s30, [#allocation9], %s1812_s19, %s1812_s19, %s1813_s20  }
  0x3d   : > { %s1615_s8 = scalar_lea.hbm %s2682_s2, 512 }
  0x3e   : > { %p1616_p11 = scmp.ne.s32.totalorder %s2682_s2, %s1615_s8  ;;  %p1622_p0 = scmp.lt.u32.totalorder %s1615_s8, %s2682_s2 }
  0x40   : > { %p1618_p12 = pnand %p1616_p11, %p1919_p8 }
  0x42   : > { %p1619_p13 = pneg %p1618_p12 }
  0x44   : > { %p1624_p2 = pnand %p1622_p0, %p1619_p13 }
  0x46   : > { %1627 = shalt.err (!%p1624_p2)
}
  0x47   : > { %s1628_s30 = scalar_lea.vmem %s1909_s9, 512  ;;  %p1636_p4 = scmp.lt.s32.totalorder %s1909_s9, %s1909_s9 }
  0x48   : > { %p1629_p5 = scmp.ne.s32.totalorder %s1909_s9, %s1628_s30  ;;  %p1637_p10 = scmp.lt.s32.totalorder %s1628_s30, %s1628_s30 }
  0x4a   : > { %p1631_p7 = pnand %p1629_p5, %p1919_p8  ;;  %p1638_p11 = por %p1637_p10, %p1636_p4 }
  0x4c   : > { %p1632_p9 = pneg %p1631_p7 }
  0x4e   : > { %p1639_p12 = pnand %p1638_p11, %p1632_p9 }
  0x50   : > { %1642 = shalt.err (!%p1639_p12)
}
  0x51   : > { %1463 = dma.hbm_to_vmem [thread:$0]  (!%p1903_p6), %s2682_s2, 512, %s1909_s9, [#allocation6], %s1812_s19, %s1812_s19, %s1813_s20  }
  0x52   : > { %s1814_s26 = smov [#allocation10]   ;;  %s1643_s29 = scalar_lea.hbm %s2684_s4, 768 }
  0x53   : > { %s238_s17 = sshll.u32 %s1814_s26, 4  ;;  %p1644_p13 = scmp.ne.s32.totalorder %s2684_s4, %s1643_s29  ;;  %s239_s17 = int_to_ptr.vmem [resolvable:$true] %s238_s17 }
  0x54   : > { %p1650_p5 = scmp.lt.u32.totalorder %s1643_s29, %s2684_s4 }
  0x55   : > { %p1646_p0 = pnand %p1644_p13, %p1919_p8 }
  0x57   : > { %p1647_p2 = pneg %p1646_p0 }
  0x59   : > { %p1652_p7 = pnand %p1650_p5, %p1647_p2 }
  0x5b   : > { %1655 = shalt.err (!%p1652_p7)
}
  0x5c   : > { %s1656_s9 = scalar_lea.vmem %s239_s17, 768  ;;  %p1664_p11 = scmp.lt.s32.totalorder %s239_s17, %s239_s17 }
  0x5d   : > { %p1657_p9 = scmp.ne.s32.totalorder %s239_s17, %s1656_s9  ;;  %p1665_p12 = scmp.lt.s32.totalorder %s1656_s9, %s1656_s9 }
  0x5f   : > { %p1659_p4 = pnand %p1657_p9, %p1919_p8  ;;  %p1666_p1 = por %p1665_p12, %p1664_p11 }
  0x61   : > { %p1660_p10 = pneg %p1659_p4 }
  0x63   : > { %p1667_p3 = pnand %p1666_p1, %p1660_p10 }
  0x65   : > { %1670 = shalt.err (!%p1667_p3)
}
  0x66   : > { %s1815_s13 = smov 128   ;;  %s1816_s30 = smov 8  }
  0x67   : > { %1469 = dma.hbm_to_vmem [thread:$0]  (!%p1903_p6), %s2684_s4, 768, %s239_s17, [#allocation9], %s1815_s13, %s1815_s13, %s1816_s30  }
  0x68   : > { %s1817_s26 = smov [#allocation11]   ;;  %s1671_s8 = scalar_lea.hbm %s2685_s5, 768 }
  0x69   : > { %s251_s18 = sshll.u32 %s1817_s26, 4  ;;  %p1672_p1 = scmp.ne.s32.totalorder %s2685_s5, %s1671_s8  ;;  %s252_s18 = int_to_ptr.vmem [resolvable:$true] %s251_s18 }
  0x6a   : > { %p1678_p0 = scmp.lt.u32.totalorder %s1671_s8, %s2685_s5 }
  0x6b   : > { %p1674_p3 = pnand %p1672_p1, %p1919_p8 }
  0x6d   : > { %p1675_p13 = pneg %p1674_p3 }
  0x6f   : > { %p1680_p2 = pnand %p1678_p0, %p1675_p13 }
  0x71   : > { %1683 = shalt.err (!%p1680_p2)
}
  0x72   : > { %s1684_s17 = scalar_lea.vmem %s252_s18, 768  ;;  %p1692_p4 = scmp.lt.s32.totalorder %s252_s18, %s252_s18 }
  0x73   : > { %p1685_p5 = scmp.ne.s32.totalorder %s252_s18, %s1684_s17  ;;  %p1693_p10 = scmp.lt.s32.totalorder %s1684_s17, %s1684_s17 }
  0x75   : > { %p1687_p7 = pnand %p1685_p5, %p1919_p8  ;;  %p1694_p11 = por %p1693_p10, %p1692_p4 }
  0x77   : > { %p1688_p9 = pneg %p1687_p7 }
  0x79   : > { %p1695_p12 = pnand %p1694_p11, %p1688_p9 }
  0x7b   : > { %1698 = shalt.err (!%p1695_p12)
}
  0x7c   : > { %1472 = dma.hbm_to_vmem [thread:$0]  (!%p1903_p6), %s2685_s5, 768, %s252_s18, [#allocation12], %s1815_s13, %s1815_s13, %s1816_s30  }
  0x7d   : > { %s1307_s15 = sadd.s32 4294967294, %s1807_s24   ;;  %s2033_s7 = sadd.s32 1, %s1807_s24  }
  0x7e   : > { %s32_s26 = sadd.s32 1, %s1803_s23  ;;  %s29_s25 = ssub.s32 %s1807_s24, %s2033_s7 }
  0x7f   : > { %p39_p8 = scmp.ne.s32.totalorder %s1803_s23, %s1799_s22  ;;  %p30_p1 = scmp.eq.s32.totalorder %s29_s25, 0 }
  0x80   : > { %p40_p3 = scmp.eq.s32.totalorder %s1807_s24, 0  ;;  %p45_p13 = scmp.ne.s32.totalorder %s1799_s22, %s1795_s21 }
  0x81   : > { %p174_p0 = scmp.eq.s32.totalorder %s1887_s27, 1  ;;  %p2708_p5 = scmp.eq.s32.totalorder %s1887_s27, 0 }
  0x82   : > { %s2045_s29 = scalar_select %p30_p1, %s1803_s23, %s32_s26  }
  0x83   : > { %p41_p2 = por %p40_p3, %p39_p8  ;;  %p2049_p7 = por %p2708_p5, %p45_p13 }
  0x84   : > { %p2053_p6 = por %p174_p0, %p39_p8  ;;  %p180_p9 = scmp.eq.s32.totalorder %s1307_s15, 1 }
  0x85   : > { %p1486_p4 = scmp.lt.s32.totalorder %s1807_s24, 2  ;;  %s265_s30 = sand.u32 1, %s1803_s23  }
  0x86   : > { %s2710_s13 = scalar_select %p2053_p6, 1, 0 }
  0x87   : > { %p2059_p10 = por %p180_p9, %p45_p13  ;;  %s1315_s10 = sshll.u32 %s265_s30, 5 }
  0x88   : > { %s1335_s11 = sshll.u32 %s1807_s24, 9  ;;  %s269_s14 = scalar_lea.vmem [#allocation2], %s1315_s10 }
  0x89   : > { %s2711_s18 = scalar_select %p2059_p10, 1, 0 }
  0x8a   : > { %s2067_s17 = scalar_lea.hbm %s2680_s0, %s1335_s11  ;;  %s276_s16 = sshll.u32 %s269_s14, 4  ;;  %s2073_s16 = int_to_ptr.vmem [resolvable:$true] %s276_s16 }
  0x8b   : > { %p2069_p11 = pnand %p1486_p4, %p41_p2  ;;  %s2075_s26 = scalar_lea.sflag [#allocation3], %s265_s30 }
  0x8c   : > { %s1699_s25 = scalar_lea.hbm %s2067_s17, 512  ;;  %s1704_s12 = scalar_lea.hbm %s2680_s0, 1024 }
  0x8d   : > { %p1700_p12 = scmp.ne.s32.totalorder %s2067_s17, %s1699_s25  ;;  %p1701_p8 = pneg %p2069_p11 }
  0x8e   : > { %p1705_p13 = scmp.lt.u32.totalorder %s2067_s17, %s2680_s0  ;;  %p1706_p0 = scmp.lt.u32.totalorder %s1704_s12, %s1699_s25 }
  0x8f   : > { %p1702_p1 = pnand %p1701_p8, %p1700_p12  ;;  %p1708_p5 = scmp.lt.u32.totalorder %s1699_s25, %s2067_s17 }
  0x90   : > { %p1707_p2 = por %p1706_p0, %p1705_p13 }
  0x91   : > { %p1703_p3 = pneg %p1702_p1 }
  0x92   : > { %p1709_p9 = por %p1708_p5, %p1707_p2 }
  0x94   : > { %p1710_p4 = pnand %p1709_p9, %p1703_p3 }
  0x96   : > { %1713 = shalt.err (!%p1710_p4)
}
  0x97   : > { %s1714_s30 = scalar_lea.vmem %s2073_s16, 512  ;;  %s1818_s10 = smov [#allocation2]  }
  0x98   : > { %p1715_p12 = scmp.ne.s32.totalorder %s2073_s16, %s1714_s30  ;;  %s1719_s11 = sshll.u32 %s1818_s10, 4  ;;  %s1720_s11 = int_to_ptr.vmem [resolvable:$false] %s1719_s11 }
  0x99   : > { %s1721_s9 = scalar_lea.vmem %s1720_s11, 1024  ;;  %p1722_p6 = scmp.lt.s32.totalorder %s2073_s16, %s1720_s11 }
  0x9a   : > { %p1717_p1 = pnand %p1715_p12, %p1701_p8  ;;  %p1723_p13 = scmp.lt.s32.totalorder %s1721_s9, %s1714_s30 }
  0x9c   : > { %p1718_p10 = pneg %p1717_p1  ;;  %p1724_p0 = por %p1723_p13, %p1722_p6 }
  0x9e   : > { %p1725_p2 = pnand %p1724_p0, %p1718_p10 }
  0xa0   : > { %1728 = shalt.err (!%p1725_p2)
}
  0xa1   : > { %1476 = dma.hbm_to_vmem [thread:$0]  (!%p2069_p11), %s2067_s17, 512, %s2073_s16, %s2075_s26, %s1812_s19, %s1812_s19, %s1813_s20  }
  0xa2   : > { %p2713_p8 = scmp.ne.s32.totalorder %s2705_s28, 0 }
  0xa3   : > { %s2109_s25 = sand.u32 (!%p2713_p8), 1, %s1799_s22  }
  0xa4   : > { %288 = sbr.rel (%p2713_p8) target bundleno = 2265 (0x8d9), region = 44  ;;  %s2690_s12 = sshll.u32 (!%p2713_p8), %s2109_s25, 5 }
  0xa5   : > { %s291_s14 = scalar_lea.sflag (!%p2713_p8), [#allocation3], %s2109_s25  ;;  %s2115_s15 = scalar_lea.vmem (!%p2713_p8), [#allocation2], %s2690_s12 }
  0xab   : > { %1774 = dma.done.wait (%p2049_p7), %s291_s14, 512  }
  0xac   : > { %1776 = vsyncadd (%p2049_p7), %s291_s14, 4294966784  ;;  %p2714_p6 = scmp.eq.s32.totalorder %s1887_s27, 0 }
  0xae   : > { %1778 = dma.done.wait (%p2714_p6), [#allocation6], 1024   ;;  %p2715_p10 = pmov %p2714_p6 }
  0xaf   : > { %p2716_p11 = pmov %p2714_p6 }
  0xb0   : > { %1780 = vsyncadd (%p2715_p10), [#allocation6], 4294966272 }
  0xb1   : > { %1782 = dma.done.wait (%p2716_p11), [#allocation9], 1280   ;;  %p2717_p3 = pmov %p2714_p6 }
  0xb3   : > { %1784 = vsyncadd (%p2717_p3), [#allocation9], 4294966016  ;;  %p2718_p5 = pmov %p2717_p3 }
  0xb4   : > { %p2719_p9 = pmov %p2717_p3 }
  0xb5   : > { %1786 = dma.done.wait (%p2718_p5), [#allocation12], 768  }
  0xb6   : > { %1788 = vsyncadd (%p2719_p9), [#allocation12], 4294966528  ;;  %v2134_v0 = vld [vmem:[%s2115_s15 + $0x8] sm:$0xff]  ;;  %v2137_v1 = vld [vmem:[%s2115_s15] sm:$0xff]  ;;  %s1819_s28 = smov 17   ;;  %s2703_s19 = smov 16   ;;  %v355_v8 = vlaneseq }
  0xb7   : > { %351 = vrot.lane.b32.xlu1 %v2134_v0, %s1819_s28  ;;  %347 = vrot.lane.b32.xlu0 %v2137_v1, %s1819_s28  ;;  %v2144_v2 = vld [vmem:[%s2115_s15 + $0x18] sm:$0xff]  ;;  %v2147_v3 = vld [vmem:[%s2115_s15 + $0x10] sm:$0xff]  ;;  %s2701_s20 = smov 15   ;;  %s2699_s8 = smov 1   ;;  %v589_v4 = vld [vmem:[#allocation7 + $0x8] sm:$0xff]  ;;  %vm604_vm0 = vcmask 130048  }
  0xb8   : > { %s2697_s17 = smov 127   ;;  %s2695_s16 = smov 113   ;;  %1326 = vmatprep.mubr.msk.f32.mxu0 %vm604_vm0, %v589_v4  ;;  %v1827_v5 = vmov 0   ;;  %v592_v6 = vld [vmem:[#allocation10] sm:$0xff]  ;;  %v593_v7 = vld [vmem:[#allocation10 + $0x8] sm:$0xff]  ;;  %v365_v9 = vshrl.u32 %v355_v8, 7 }
  0xb9   : > { %s2693_s26 = smov 112   ;;  %s2691_s30 = smov 111   ;;  %1545 = vset.pattern.permute.xlu0 %v1827_v5  ;;  %1546 = vset.pattern.permute.xlu1 %v1827_v5  ;;  %v2210_v10 = vand.u32 127, %v355_v8  ;;  %v362_v13 = vld [vmem:[#allocation5] ss:$8 sm:$0x3] }
  0xba   : > { %v2212_v11 = vsub.s32 0, %v365_v9  ;;  %v2214_v12 = vsub.s32 1, %v365_v9  ;;  %v392_v28 = vld [vmem:[#allocation5 + $0x1] ss:$8 sm:$0x3]  ;;  %vm710_vm9 = vcmask 7168  }
  0xbb   : > { %353 = vrot.lane.b32.xlu1 %v2144_v2, %s1819_s28  ;;  %349 = vrot.lane.b32.xlu0 %v2147_v3, %s1819_s28  ;;  %vm357_vm1 = vcmp.lt.s32.totalorder %v2210_v10, 17  ;;  %vm386_vm2 = vcmp.lt.s32.totalorder %v2210_v10, 16  ;;  %v422_v45 = vld [vmem:[#allocation5 + $0x2] ss:$8 sm:$0x3]  ;;  %vm416_vm3 = vcmp.lt.s32.totalorder %v2210_v10, 15 }
  0xbc   : > { %v2218_v16 = vrot.slane %v362_v13, %v2212_v11  ;;  %v2221_v17 = vrot.slane %v362_v13, %v2214_v12  ;;  %v2237_v33 = vrot.slane %v392_v28, %v2212_v11  ;;  %v2240_v34 = vrot.slane %v392_v28, %v2214_v12  ;;  %v452_v62 = vld [vmem:[#allocation5 + $0x3] ss:$8 sm:$0x3]  ;;  %p2728_p4 = scmp.ne.s32.totalorder %s2710_s13, 0 }
  0xbd   : > { %v2256_v50 = vrot.slane %v422_v45, %v2212_v11  ;;  %v2259_v51 = vrot.slane %v422_v45, %v2214_v12  ;;  %vm446_vm4 = vcmp.lt.s32.totalorder %v2210_v10, 1  ;;  %v2278_v8 = vrot.slane %v452_v62, %v2214_v12 }
  0xbe   : > { %vm476_vm5 = vcmp.lt.s32.totalorder %v2210_v10, 127  ;;  %vm506_vm6 = vcmp.lt.s32.totalorder %v2210_v10, 113  ;;  %vm536_vm7 = vcmp.lt.s32.totalorder %v2210_v10, 112  ;;  %vm566_vm8 = vcmp.lt.s32.totalorder %v2210_v10, 111 }
  0xbf   : > { %380 = vrot.lane.b32.xlu1 %v2147_v3, %s2703_s19  ;;  %378 = vrot.lane.b32.xlu0 %v2137_v1, %s2703_s19 }
  0xc3   : > { %384 = vrot.lane.b32.xlu1 %v2144_v2, %s2703_s19  ;;  %382 = vrot.lane.b32.xlu0 %v2134_v0, %s2703_s19 }
  0xc7   : > { %410 = vrot.lane.b32.xlu1 %v2147_v3, %s2701_s20  ;;  %408 = vrot.lane.b32.xlu0 %v2137_v1, %s2701_s20 }
  0xcb   : > { %414 = vrot.lane.b32.xlu1 %v2144_v2, %s2701_s20  ;;  %412 = vrot.lane.b32.xlu0 %v2134_v0, %s2701_s20 }
  0xcf   : > { %440 = vrot.lane.b32.xlu1 %v2147_v3, %s2699_s8  ;;  %438 = vrot.lane.b32.xlu0 %v2137_v1, %s2699_s8 }
  0xd3   : > { %444 = vrot.lane.b32.xlu1 %v2144_v2, %s2699_s8  ;;  %442 = vrot.lane.b32.xlu0 %v2134_v0, %s2699_s8 }
  0xd7   : > { %470 = vrot.lane.b32.xlu1 %v2147_v3, %s2697_s17  ;;  %468 = vrot.lane.b32.xlu0 %v2137_v1, %s2697_s17 }
  0xdb   : > { %474 = vrot.lane.b32.xlu1 %v2144_v2, %s2697_s17  ;;  %472 = vrot.lane.b32.xlu0 %v2134_v0, %s2697_s17 }
  0xdf   : > { %500 = vrot.lane.b32.xlu1 %v2147_v3, %s2695_s16  ;;  %498 = vrot.lane.b32.xlu0 %v2137_v1, %s2695_s16 }
  0xe3   : > { %504 = vrot.lane.b32.xlu1 %v2144_v2, %s2695_s16  ;;  %502 = vrot.lane.b32.xlu0 %v2134_v0, %s2695_s16 }
  0xe7   : > { %530 = vrot.lane.b32.xlu1 %v2147_v3, %s2693_s26  ;;  %528 = vrot.lane.b32.xlu0 %v2137_v1, %s2693_s26 }
  0xeb   : > { %534 = vrot.lane.b32.xlu1 %v2144_v2, %s2693_s26  ;;  %532 = vrot.lane.b32.xlu0 %v2134_v0, %s2693_s26  ;;  %s1828_s26 = smov 0.0  }
  0xef   : > { %560 = vrot.lane.b32.xlu1 %v2147_v3, %s2691_s30  ;;  %558 = vrot.lane.b32.xlu0 %v2137_v1, %s2691_s30 }
  0xf3   : > { %564 = vrot.lane.b32.xlu1 %v2144_v2, %s2691_s30  ;;  %562 = vrot.lane.b32.xlu0 %v2134_v0, %s2691_s30 }
  0xf7   : > { %596 = vperm.xlu0 %1545, %v592_v6  }
  0xfb   : > { %601 = vperm.xlu0 %1545, %v593_v7   ;;  %v2275_v7 = vrot.slane %v452_v62, %v2212_v11 }
 0x129   : > { %v352_v14 = vpop.permute.xlu1 %351  ;;  %v348_v15 = vpop.permute.xlu0 %347 }
 0x12a   : > { %v358_v18 = vsel %vm357_vm1, %v348_v15, %v352_v14  ;;  %v360_v19 = vsel %vm357_vm1, %v352_v14, %v348_v15 }
 0x12b   : > { %v374_v24 = vmul.f32 %v2218_v16, %v360_v19  ;;  %v375_v26 = vmul.f32 %v2221_v17, %v358_v18 }
 0x12d   : > { %v354_v20 = vpop.permute.xlu1 %353  ;;  %v350_v21 = vpop.permute.xlu0 %349 }
 0x12e   : > { %v359_v22 = vsel %vm357_vm1, %v350_v21, %v354_v20  ;;  %v361_v23 = vsel %vm357_vm1, %v354_v20, %v350_v21 }
 0x12f   : > { %v376_v25 = vmul.f32 %v2218_v16, %v361_v23  ;;  %v377_v27 = vmul.f32 %v2221_v17, %v359_v22 }
 0x131   : > { %v381_v29 = vpop.permute.xlu1 %380  ;;  %v379_v30 = vpop.permute.xlu0 %378  ;;  %v1337_v31 = vpack.c.bf16 %v377_v27, %v375_v26  ;;  %v1339_v32 = vpack.c.bf16 %v376_v25, %v374_v24  ;;  %v482_v24 = vld [vmem:[#allocation5 + $0x5] ss:$8 sm:$0x3] }
 0x133   : > { %1338 = vmatprep.subr.bf16.mxu0 %v1337_v31  ;;  %v2299_v31 = vrot.slane %v482_v24, %v2214_v12 }
 0x134   : > { %1340 = vmatpush1.bf16.msra.mxu0 %v1339_v32  ;;  %v1355_v32 = vpack.c.bf16 %v2147_v3, %v2137_v1 }
 0x135   : > { %v385_v35 = vpop.permute.xlu1 %384  ;;  %v383_v36 = vpop.permute.xlu0 %382 }
 0x136   : > { %v388_v37 = vsel %vm386_vm2, %v381_v29, %v385_v35  ;;  %v390_v38 = vsel %vm386_vm2, %v385_v35, %v381_v29  ;;  %v387_v39 = vsel %vm386_vm2, %v379_v30, %v383_v36  ;;  %v389_v40 = vsel %vm386_vm2, %v383_v36, %v379_v30 }
 0x137   : > { %v406_v41 = vmul.f32 %v2237_v33, %v390_v38  ;;  %v407_v42 = vmul.f32 %v2240_v34, %v388_v37  ;;  %v404_v43 = vmul.f32 %v2237_v33, %v389_v40  ;;  %v405_v44 = vmul.f32 %v2240_v34, %v387_v39 }
 0x138   : > { %v1353_v29 = vpack.c.bf16 %v2144_v2, %v2134_v0  ;;  %v2296_v30 = vrot.slane %v482_v24, %v2212_v11  ;;  %v572_v24 = vld [vmem:[#allocation5 + $0x10] ss:$8 sm:$0x3] }
 0x139   : > { %v411_v46 = vpop.permute.xlu1 %410  ;;  %v409_v47 = vpop.permute.xlu0 %408  ;;  %v1341_v48 = vpack.c.bf16 %v407_v42, %v405_v44  ;;  %v1343_v49 = vpack.c.bf16 %v406_v41, %v404_v43  ;;  %v512_v41 = vld [vmem:[#allocation5 + $0x6] ss:$8 sm:$0x3] }
 0x13b   : > { %1342 = vmatprep.subr.bf16.mxu0 %v1341_v48 }
 0x13c   : > { %1344 = vmatpush1.bf16.msra.mxu0 %v1343_v49 }
 0x13d   : > { %v415_v52 = vpop.permute.xlu1 %414  ;;  %v413_v53 = vpop.permute.xlu0 %412 }
 0x13e   : > { %v418_v54 = vsel %vm416_vm3, %v411_v46, %v415_v52  ;;  %v420_v55 = vsel %vm416_vm3, %v415_v52, %v411_v46  ;;  %v417_v56 = vsel %vm416_vm3, %v409_v47, %v413_v53  ;;  %v419_v57 = vsel %vm416_vm3, %v413_v53, %v409_v47 }
 0x13f   : > { %v436_v58 = vmul.f32 %v2256_v50, %v420_v55  ;;  %v437_v59 = vmul.f32 %v2259_v51, %v418_v54  ;;  %v434_v60 = vmul.f32 %v2256_v50, %v419_v57  ;;  %v435_v61 = vmul.f32 %v2259_v51, %v417_v56 }
 0x140   : > { %v2317_v46 = vrot.slane %v512_v41, %v2212_v11  ;;  %v2320_v47 = vrot.slane %v512_v41, %v2214_v12  ;;  %v588_v41 = vld [vmem:[#allocation7] sm:$0xff] }
 0x141   : > { %v441_v63 = vpop.permute.xlu1 %440  ;;  %v439_v4 = vpop.permute.xlu0 %438  ;;  %v1345_v5 = vpack.c.bf16 %v437_v59, %v435_v61  ;;  %v1347_v6 = vpack.c.bf16 %v436_v58, %v434_v60  ;;  %v542_v60 = vld [vmem:[#allocation5 + $0x7] ss:$8 sm:$0x3] }
 0x143   : > { %1346 = vmatprep.subr.bf16.mxu0 %v1345_v5  ;;  %v2336_v5 = vrot.slane %v542_v60, %v2212_v11 }
 0x144   : > { %1348 = vmatpush1.bf16.msra.mxu0 %v1347_v6  ;;  %v2339_v6 = vrot.slane %v542_v60, %v2214_v12 }
 0x145   : > { %v445_v9 = vpop.permute.xlu1 %444  ;;  %v443_v13 = vpop.permute.xlu0 %442 }
 0x146   : > { %v448_v14 = vsel %vm446_vm4, %v441_v63, %v445_v9  ;;  %v450_v15 = vsel %vm446_vm4, %v445_v9, %v441_v63  ;;  %v447_v18 = vsel %vm446_vm4, %v439_v4, %v443_v13  ;;  %v449_v19 = vsel %vm446_vm4, %v443_v13, %v439_v4 }
 0x147   : > { %v466_v20 = vmul.f32 %v2275_v7, %v450_v15  ;;  %v467_v21 = vmul.f32 %v2278_v8, %v448_v14  ;;  %v464_v22 = vmul.f32 %v2275_v7, %v449_v19  ;;  %v465_v23 = vmul.f32 %v2278_v8, %v447_v18 }
 0x149   : > { %v471_v25 = vpop.permute.xlu1 %470  ;;  %v469_v26 = vpop.permute.xlu0 %468  ;;  %v1349_v27 = vpack.c.bf16 %v467_v21, %v465_v23  ;;  %v1351_v28 = vpack.c.bf16 %v466_v20, %v464_v22 }
 0x14b   : > { %1350 = vmatprep.subr.bf16.mxu0 %v1349_v27 }
 0x14c   : > { %1352 = vmatpush1.bf16.msra.mxu0 %v1351_v28 }
 0x14d   : > { %v475_v35 = vpop.permute.xlu1 %474  ;;  %v473_v36 = vpop.permute.xlu0 %472  ;;  %1354 = vmatprep.subr.bf16.mxu0 %v1353_v29  ;;  %v2355_v29 = vrot.slane %v572_v24, %v2212_v11 }
 0x14e   : > { %v478_v37 = vsel %vm476_vm5, %v471_v25, %v475_v35  ;;  %v480_v0 = vsel %vm476_vm5, %v475_v35, %v471_v25  ;;  %v477_v2 = vsel %vm476_vm5, %v469_v26, %v473_v36  ;;  %v479_v38 = vsel %vm476_vm5, %v473_v36, %v469_v26 }
 0x14f   : > { %v496_v39 = vmul.f32 %v2296_v30, %v478_v37  ;;  %v497_v40 = vmul.f32 %v2299_v31, %v480_v0  ;;  %v494_v1 = vmul.f32 %v2296_v30, %v477_v2  ;;  %v495_v3 = vmul.f32 %v2299_v31, %v479_v38 }
 0x150   : > { %1356 = vmatpush1.bf16.msra.mxu0 %v1355_v32  ;;  %v2358_v32 = vrot.slane %v572_v24, %v2214_v12 }
 0x151   : > { %v501_v42 = vpop.permute.xlu1 %500  ;;  %v499_v43 = vpop.permute.xlu0 %498  ;;  %v1357_v44 = vpack.c.bf16 %v497_v40, %v495_v3  ;;  %v1359_v45 = vpack.c.bf16 %v496_v39, %v494_v1 }
 0x153   : > { %1358 = vmatprep.subr.bf16.mxu0 %v1357_v44 }
 0x154   : > { %1360 = vmatpush1.bf16.msra.mxu0 %v1359_v45 }
 0x155   : > { %v505_v48 = vpop.permute.xlu1 %504  ;;  %v503_v49 = vpop.permute.xlu0 %502 }
 0x156   : > { %v508_v52 = vsel %vm506_vm6, %v501_v42, %v505_v48  ;;  %v510_v53 = vsel %vm506_vm6, %v505_v48, %v501_v42  ;;  %v507_v54 = vsel %vm506_vm6, %v499_v43, %v503_v49  ;;  %v509_v55 = vsel %vm506_vm6, %v503_v49, %v499_v43  ;;  %v591_v42 = vld [vmem:[#allocation7 + $0x18] sm:$0xff]  ;;  %v590_v43 = vld [vmem:[#allocation7 + $0x10] sm:$0xff] }
 0x157   : > { %v526_v56 = vmul.f32 %v2317_v46, %v508_v52  ;;  %v527_v57 = vmul.f32 %v2320_v47, %v510_v53  ;;  %v524_v58 = vmul.f32 %v2317_v46, %v507_v54  ;;  %v525_v59 = vmul.f32 %v2320_v47, %v509_v55 }
 0x159   : > { %v531_v61 = vpop.permute.xlu1 %530  ;;  %v529_v62 = vpop.permute.xlu0 %528  ;;  %v1361_v63 = vpack.c.bf16 %v527_v57, %v525_v59  ;;  %v1363_v4 = vpack.c.bf16 %v526_v56, %v524_v58 }
 0x15b   : > { %1362 = vmatprep.subr.bf16.mxu0 %v1361_v63 }
 0x15c   : > { %1364 = vmatpush1.bf16.msra.mxu0 %v1363_v4 }
 0x15d   : > { %v535_v9 = vpop.permute.xlu1 %534  ;;  %v533_v13 = vpop.permute.xlu0 %532 }
 0x15e   : > { %v538_v14 = vsel %vm536_vm7, %v531_v61, %v535_v9  ;;  %v540_v15 = vsel %vm536_vm7, %v535_v9, %v531_v61  ;;  %v537_v18 = vsel %vm536_vm7, %v529_v62, %v533_v13  ;;  %v539_v19 = vsel %vm536_vm7, %v533_v13, %v529_v62 }
 0x15f   : > { %v556_v20 = vmul.f32 %v2336_v5, %v538_v14  ;;  %v557_v21 = vmul.f32 %v2339_v6, %v540_v15  ;;  %v554_v22 = vmul.f32 %v2336_v5, %v537_v18  ;;  %v555_v23 = vmul.f32 %v2339_v6, %v539_v19 }
 0x161   : > { %v561_v25 = vpop.permute.xlu1 %560  ;;  %v559_v26 = vpop.permute.xlu0 %558  ;;  %v1365_v27 = vpack.c.bf16 %v557_v21, %v555_v23  ;;  %v1367_v28 = vpack.c.bf16 %v556_v20, %v554_v22 }
 0x163   : > { %1366 = vmatprep.subr.bf16.mxu0 %v1365_v27 }
 0x164   : > { %1368 = vmatpush1.bf16.msra.mxu0 %v1367_v28 }
 0x165   : > { %v565_v35 = vpop.permute.xlu1 %564  ;;  %v563_v36 = vpop.permute.xlu0 %562 }
 0x166   : > { %v568_v37 = vsel %vm566_vm8, %v561_v25, %v565_v35  ;;  %v570_v0 = vsel %vm566_vm8, %v565_v35, %v561_v25  ;;  %v567_v2 = vsel %vm566_vm8, %v559_v26, %v563_v36  ;;  %v569_v38 = vsel %vm566_vm8, %v563_v36, %v559_v26 }
 0x167   : > { %v586_v11 = vmul.f32 %v2355_v29, %v568_v37  ;;  %v587_v12 = vmul.f32 %v2358_v32, %v570_v0  ;;  %v584_v39 = vmul.f32 %v2355_v29, %v567_v2  ;;  %v585_v40 = vmul.f32 %v2358_v32, %v569_v38 }
 0x169   : > { %v1369_v1 = vpack.c.bf16 %v587_v12, %v585_v40  ;;  %v1371_v3 = vpack.c.bf16 %v586_v11, %v584_v39 }
 0x16b   : > { %1370 = vmatprep.subr.bf16.mxu0 %v1369_v1 }
 0x16c   : > { %1372 = vmatpush1.bf16.msra.mxu0 %v1371_v3 }
 0x16f   : > { %676 = vmatmul.mubr.f32.vlgmr.msra.gmra.mrb[0].mxu0 %v588_v41 }
 0x170   : > { %1327 = vmatprep.mubr.msk.f32.mxu0 %vm604_vm0, %v591_v42 }
 0x173   : > { %682 = vmatmul.mubr.f32.gmra.mrb[2].mxu0 %v590_v43 }
 0x176   : > { %v597_v44 = vpop.permute.xlu0 %596 }
 0x17a   : > { %v602_v54 = vpop.permute.xlu0 %601 }
 0x242   : > { %v677_v45 = vpop.f32.mrb[0].mxu0 }
 0x243   : > { %v2373_v48 = vadd.f32 %v677_v45, %v597_v44  ;;  %v679_v49 = vpop.f32.mrb[1].mxu0 }
 0x244   : > { %v2375_v52 = vadd.f32 %v679_v49, %v597_v44 }
 0x245   : > { %v694_v53 = vmul.f32 %v2373_v48, %v2373_v48 }
 0x246   : > { %v683_v55 = vpop.f32.mrb[2].mxu0  ;;  %v688_v56 = vadd.f32 %v2375_v52, %v2373_v48  ;;  %v695_v57 = vmul.f32 %v2375_v52, %v2375_v52 }
 0x247   : > { %v2383_v58 = vadd.f32 %v683_v55, %v602_v54  ;;  %v685_v59 = vpop.f32.mrb[3].mxu0 }
 0x248   : > { %v2385_v60 = vadd.f32 %v685_v59, %v602_v54  ;;  %689 = vadd.xlane.f32.xlu1 %v688_v56  ;;  %v698_v61 = vadd.f32 %v695_v57, %v694_v53 }
 0x249   : > { %v696_v63 = vmul.f32 %v2383_v58, %v2383_v58 }
 0x24a   : > { %699 = vadd.xlane.f32.xlu0 %v698_v61  ;;  %v691_v62 = vadd.f32 %v2385_v60, %v2383_v58  ;;  %v697_v4 = vmul.f32 %v2385_v60, %v2385_v60  ;;  %v705_v61 = vld [vmem:[#allocation10 + $0x10] sm:$0xff] }
 0x24c   : > { %692 = vadd.xlane.f32.xlu1 %v691_v62  ;;  %v701_v9 = vadd.f32 %v697_v4, %v696_v63 }
 0x250   : > { %702 = vadd.xlane.f32.xlu1 %v701_v9 }
 0x2d5   : > { %v690_v13 = vpop.xlane.xlu1 %689 }
 0x2d6   : > { %v711_v14 = vsel %vm710_vm9, %v690_v13, 0.0 }
 0x2d7   : > { %v700_v15 = vpop.xlane.xlu0 %699  ;;  %712 = vadd.xlane.f32.xlu0 %v711_v14 }
 0x2d8   : > { %v722_v18 = vsel %vm710_vm9, %v700_v15, 0.0  ;;  %v706_v15 = vld [vmem:[#allocation10 + $0x18] sm:$0xff] }
 0x2d9   : > { %723 = vadd.xlane.f32.xlu1 %v722_v18  ;;  %v693_v19 = vpop.xlane.xlu1 %692 }
 0x2da   : > { %v745_v20 = vsel %vm710_vm9, %v693_v19, 0.0 }
 0x2db   : > { %746 = vadd.xlane.f32.xlu0 %v745_v20 }
 0x2dd   : > { %v703_v21 = vpop.xlane.xlu1 %702 }
 0x2de   : > { %v756_v22 = vsel %vm710_vm9, %v703_v21, 0.0  ;;  %v708_v21 = vld [vmem:[#allocation10 + $0x20] sm:$0xff] }
 0x2df   : > { %757 = vadd.xlane.f32.xlu1 %v756_v22  ;;  %v709_v22 = vld [vmem:[#allocation10 + $0x28] sm:$0xff] }
 0x364   : > { %v713_v23 = vpop.xlane.xlu0 %712 }
 0x365   : > { %v714_v24 = vrot.slane %v713_v23, 4 }
 0x366   : > { %v724_v25 = vpop.xlane.xlu1 %723 }
 0x367   : > { %v715_v26 = vadd.f32 %v714_v24, %v713_v23  ;;  %v725_v27 = vrot.slane %v724_v25, 4 }
 0x368   : > { %v747_v39 = vpop.xlane.xlu0 %746 }
 0x369   : > { %v716_v28 = vrot.slane %v715_v26, 2  ;;  %v726_v35 = vadd.f32 %v725_v27, %v724_v25  ;;  %v748_v1 = vrot.slane %v747_v39, 4 }
 0x36b   : > { %v727_v36 = vrot.slane %v726_v35, 2  ;;  %v717_v37 = vadd.f32 %v716_v28, %v715_v26  ;;  %v749_v41 = vadd.f32 %v748_v1, %v747_v39 }
 0x36c   : > { %v758_v40 = vpop.xlane.xlu1 %757 }
 0x36d   : > { %v718_v0 = vrot.slane %v717_v37, 1  ;;  %v728_v2 = vadd.f32 %v727_v36, %v726_v35  ;;  %v759_v3 = vrot.slane %v758_v40, 4  ;;  %v750_v43 = vrot.slane %v749_v41, 2 }
 0x36f   : > { %v719_v38 = vadd.f32 %v718_v0, %v717_v37  ;;  %v729_v11 = vrot.slane %v728_v2, 1  ;;  %v760_v42 = vadd.f32 %v759_v3, %v758_v40  ;;  %v751_v49 = vadd.f32 %v750_v43, %v749_v41 }
 0x371   : > { %1409 = vpush %v719_v38  ;;  %v730_v12 = vadd.f32 %v729_v11, %v728_v2  ;;  %v761_v44 = vrot.slane %v760_v42, 2  ;;  %v752_v54 = vrot.slane %v751_v49, 1 }
 0x373   : > { %1411 = vpush %v730_v12  ;;  %v762_v53 = vadd.f32 %v761_v44, %v760_v42  ;;  %v753_v57 = vadd.f32 %v752_v54, %v751_v49  ;;  %v944_v42 = vld [vmem:[#allocation11 + $0x8] sm:$0xff] }
 0x375   : > { %v763_v55 = vrot.slane %v762_v53, 1 }
 0x377   : > { %v764_v59 = vadd.f32 %v763_v55, %v762_v53 }
 0x3a2   : > { %s1410_s10 = spop %1409 }
 0x3a3   : > { %s2397_s11 = smul.f32 0.00048828125, %s1410_s10 }
 0x3a4   : > { %s1412_s9 = spop %1411 }
 0x3a5   : > { %s733_s14 = smul.f32 %s2397_s11, %s2397_s11  ;;  %v742_v4 = vstv %s2397_s11  ;;  %s2724_s11 = smov 113  }
 0x3a6   : > { %s732_s12 = smul.f32 0.00048828125, %s1412_s9 }
 0x3a8   : > { %s734_s30 = ssub.f32 %s732_s12, %s733_s14 }
 0x3aa   : > { %s735_s16 = smax.f32 %s1828_s26, %s734_s30 }
 0x3ab   : > { %s736_s17 = sadd.f32 1e-05, %s735_s16 }
 0x3ad   : > { %v737_v45 = vstv %s736_s17 }
 0x3ae   : > { %1547 = vrsqrt.f32 %v737_v45 }
 0x3b8   : > { %v1548_v56 = vpop.eup %1547 }
 0x3b9   : > { %1413 = vpush %v1548_v56 }
 0x3ba   : > { %1415 = vpush %v753_v57 }
 0x3bb   : > { %1417 = vpush %v764_v59 }
 0x3ea   : > { %s1414_s12 = spop %1413 }
 0x3eb   : > { %v740_v62 = vstv %s1414_s12  ;;  %s1416_s30 = spop %1415  ;;  %s2725_s12 = smov 112  }
 0x3ec   : > { %v741_v63 = vmul.f32 %v740_v62, %v705_v61  ;;  %s755_s16 = smul.f32 0.00048828125, %s1416_s30  ;;  %s1418_s10 = spop %1417 }
 0x3ed   : > { %s766_s17 = smul.f32 0.00048828125, %s1418_s10  ;;  %s2726_s30 = smov 111  }
 0x3ee   : > { %v743_v9 = vmul.f32 %v742_v4, %v741_v63  ;;  %s767_s9 = smul.f32 %s755_s16, %s755_s16  ;;  %781 = vperm.xlu0 %1545, %v741_v63   ;;  %v776_v20 = vstv %s755_s16 }
 0x3f0   : > { %s768_s14 = ssub.f32 %s766_s17, %s767_s9  ;;  %v744_v24 = vsub.f32 %v708_v21, %v743_v9 }
 0x3f2   : > { %s769_s8 = smax.f32 %s1828_s26, %s768_s14 }
 0x3f3   : > { %s770_s20 = sadd.f32 1e-05, %s769_s8  ;;  %s2723_s8 = smov 127  }
 0x3f5   : > { %v771_v13 = vstv %s770_s20  ;;  %s2721_s20 = smov 15  }
 0x3f6   : > { %1549 = vrsqrt.f32 %v771_v13 }
 0x400   : > { %v1550_v14 = vpop.eup %1549 }
 0x401   : > { %1419 = vpush %v1550_v14 }
 0x432   : > { %s1420_s19 = spop %1419 }
 0x433   : > { %v774_v18 = vstv %s1420_s19  ;;  %s2720_s19 = smov 16  }
 0x434   : > { %v775_v19 = vmul.f32 %v774_v18, %v706_v15 }
 0x436   : > { %v777_v23 = vmul.f32 %v776_v20, %v775_v19  ;;  %786 = vperm.xlu1 %1546, %v775_v19  }
 0x438   : > { %v778_v25 = vsub.f32 %v709_v22, %v777_v23 }
 0x43a   : > { %795 = vperm.xlu1 %1546, %v744_v24   ;;  %800 = vperm.xlu0 %1545, %v778_v25  }
 0x46d   : > { %v782_v26 = vpop.permute.xlu0 %781 }
 0x46e   : > { %v789_v28 = vmul.f32 %v782_v26, %v2373_v48  ;;  %v790_v35 = vmul.f32 %v782_v26, %v2375_v52 }
 0x4b5   : > { %v787_v27 = vpop.permute.xlu1 %786 }
 0x4b6   : > { %v791_v36 = vmul.f32 %v787_v27, %v2383_v58  ;;  %v792_v37 = vmul.f32 %v787_v27, %v2385_v60  ;;  %v940_v58 = vld [vmem:[#allocation8 + $0x8] sm:$0xff]  ;;  %v943_v60 = vld [vmem:[#allocation11] sm:$0xff] }
 0x4b7   : > { %1328 = vmatprep.mubr.msk.f32.mxu1 %vm604_vm0, %v940_v58 }
 0x4b9   : > { %v796_v0 = vpop.permute.xlu1 %795  ;;  %v801_v2 = vpop.permute.xlu0 %800 }
 0x4ba   : > { %v803_v38 = vadd.f32 %v796_v0, %v789_v28  ;;  %v804_v11 = vadd.f32 %v796_v0, %v790_v35  ;;  %v805_v12 = vadd.f32 %v801_v2, %v791_v36  ;;  %v806_v39 = vadd.f32 %v801_v2, %v792_v37 }
 0x4bc   : > { %v2408_v40 = vmax.f32 %v803_v38, 0.0  ;;  %v2410_v1 = vmax.f32 %v804_v11, 0.0  ;;  %v2412_v3 = vmax.f32 %v805_v12, 0.0  ;;  %v2414_v41 = vmax.f32 %v806_v39, 0.0 }
 0x4be   : > { %811 = vrot.lane.b32.xlu1 %v2408_v40, %s1819_s28  ;;  %813 = vrot.lane.b32.xlu0 %v2412_v3, %s1819_s28  ;;  %v1389_v48 = vpack.c.bf16 %v2414_v41, %v2410_v1  ;;  %v1391_v52 = vpack.c.bf16 %v2412_v3, %v2408_v40 }
 0x4c2   : > { %815 = vrot.lane.b32.xlu1 %v2410_v1, %s1819_s28  ;;  %817 = vrot.lane.b32.xlu0 %v2414_v41, %s1819_s28  ;;  %s2722_s28 = smov 1  }
 0x4c6   : > { %827 = vrot.lane.b32.xlu1 %v2408_v40, %s2720_s19  ;;  %829 = vrot.lane.b32.xlu0 %v2412_v3, %s2720_s19 }
 0x4ca   : > { %831 = vrot.lane.b32.xlu1 %v2410_v1, %s2720_s19  ;;  %833 = vrot.lane.b32.xlu0 %v2414_v41, %s2720_s19 }
 0x4ce   : > { %843 = vrot.lane.b32.xlu1 %v2408_v40, %s2721_s20  ;;  %845 = vrot.lane.b32.xlu0 %v2412_v3, %s2721_s20 }
 0x4d2   : > { %847 = vrot.lane.b32.xlu1 %v2410_v1, %s2721_s20  ;;  %849 = vrot.lane.b32.xlu0 %v2414_v41, %s2721_s20 }
 0x4d6   : > { %859 = vrot.lane.b32.xlu1 %v2408_v40, %s2722_s28  ;;  %861 = vrot.lane.b32.xlu0 %v2412_v3, %s2722_s28 }
 0x4da   : > { %863 = vrot.lane.b32.xlu1 %v2410_v1, %s2722_s28  ;;  %865 = vrot.lane.b32.xlu0 %v2414_v41, %s2722_s28 }
 0x4de   : > { %875 = vrot.lane.b32.xlu1 %v2408_v40, %s2723_s8  ;;  %877 = vrot.lane.b32.xlu0 %v2412_v3, %s2723_s8 }
 0x4e2   : > { %879 = vrot.lane.b32.xlu1 %v2410_v1, %s2723_s8  ;;  %881 = vrot.lane.b32.xlu0 %v2414_v41, %s2723_s8 }
 0x4e6   : > { %891 = vrot.lane.b32.xlu1 %v2408_v40, %s2724_s11  ;;  %893 = vrot.lane.b32.xlu0 %v2412_v3, %s2724_s11 }
 0x4ea   : > { %895 = vrot.lane.b32.xlu1 %v2410_v1, %s2724_s11  ;;  %897 = vrot.lane.b32.xlu0 %v2414_v41, %s2724_s11 }
 0x4ee   : > { %907 = vrot.lane.b32.xlu1 %v2408_v40, %s2725_s12  ;;  %909 = vrot.lane.b32.xlu0 %v2412_v3, %s2725_s12 }
 0x4f2   : > { %911 = vrot.lane.b32.xlu1 %v2410_v1, %s2725_s12  ;;  %913 = vrot.lane.b32.xlu0 %v2414_v41, %s2725_s12 }
 0x4f6   : > { %923 = vrot.lane.b32.xlu1 %v2408_v40, %s2726_s30  ;;  %925 = vrot.lane.b32.xlu0 %v2412_v3, %s2726_s30 }
 0x4fa   : > { %927 = vrot.lane.b32.xlu1 %v2410_v1, %s2726_s30  ;;  %929 = vrot.lane.b32.xlu0 %v2414_v41, %s2726_s30 }
 0x4fe   : > { %947 = vperm.xlu1 %1546, %v943_v60  }
 0x502   : > { %952 = vperm.xlu1 %1546, %v944_v42  }
 0x530   : > { %v812_v43 = vpop.permute.xlu1 %811  ;;  %v814_v44 = vpop.permute.xlu0 %813 }
 0x534   : > { %v816_v45 = vpop.permute.xlu1 %815  ;;  %v818_v49 = vpop.permute.xlu0 %817 }
 0x535   : > { %v819_v53 = vsel %vm357_vm1, %v812_v43, %v816_v45  ;;  %v821_v54 = vsel %vm357_vm1, %v816_v45, %v812_v43  ;;  %v820_v55 = vsel %vm357_vm1, %v814_v44, %v818_v49  ;;  %v822_v56 = vsel %vm357_vm1, %v818_v49, %v814_v44 }
 0x536   : > { %v823_v57 = vmul.f32 %v821_v54, %v2218_v16  ;;  %v825_v59 = vmul.f32 %v822_v56, %v2218_v16  ;;  %v824_v61 = vmul.f32 %v819_v53, %v2221_v17  ;;  %v826_v62 = vmul.f32 %v820_v55, %v2221_v17 }
 0x538   : > { %v828_v63 = vpop.permute.xlu1 %827  ;;  %v830_v4 = vpop.permute.xlu0 %829  ;;  %v1373_v9 = vpack.c.bf16 %v826_v62, %v824_v61  ;;  %v1375_v13 = vpack.c.bf16 %v825_v59, %v823_v57 }
 0x53a   : > { %1374 = vmatprep.subr.bf16.mxu1 %v1373_v9 }
 0x53b   : > { %1376 = vmatpush1.bf16.msra.mxu1 %v1375_v13 }
 0x53c   : > { %v832_v14 = vpop.permute.xlu1 %831  ;;  %v834_v15 = vpop.permute.xlu0 %833 }
 0x53d   : > { %v835_v18 = vsel %vm386_vm2, %v828_v63, %v832_v14  ;;  %v837_v19 = vsel %vm386_vm2, %v832_v14, %v828_v63  ;;  %v836_v16 = vsel %vm386_vm2, %v830_v4, %v834_v15  ;;  %v838_v17 = vsel %vm386_vm2, %v834_v15, %v830_v4 }
 0x53e   : > { %v839_v20 = vmul.f32 %v837_v19, %v2237_v33  ;;  %v840_v21 = vmul.f32 %v835_v18, %v2240_v34  ;;  %v841_v22 = vmul.f32 %v838_v17, %v2237_v33  ;;  %v842_v23 = vmul.f32 %v836_v16, %v2240_v34 }
 0x540   : > { %v844_v24 = vpop.permute.xlu1 %843  ;;  %v846_v25 = vpop.permute.xlu0 %845  ;;  %v1377_v26 = vpack.c.bf16 %v842_v23, %v840_v21  ;;  %v1379_v27 = vpack.c.bf16 %v841_v22, %v839_v20 }
 0x542   : > { %1378 = vmatprep.subr.bf16.mxu1 %v1377_v26 }
 0x543   : > { %1380 = vmatpush1.bf16.msra.mxu1 %v1379_v27 }
 0x544   : > { %v848_v28 = vpop.permute.xlu1 %847  ;;  %v850_v35 = vpop.permute.xlu0 %849 }
 0x545   : > { %v851_v36 = vsel %vm416_vm3, %v844_v24, %v848_v28  ;;  %v853_v37 = vsel %vm416_vm3, %v848_v28, %v844_v24  ;;  %v852_v0 = vsel %vm416_vm3, %v846_v25, %v850_v35  ;;  %v854_v33 = vsel %vm416_vm3, %v850_v35, %v846_v25 }
 0x546   : > { %v855_v34 = vmul.f32 %v853_v37, %v2256_v50  ;;  %v856_v2 = vmul.f32 %v851_v36, %v2259_v51  ;;  %v857_v38 = vmul.f32 %v854_v33, %v2256_v50  ;;  %v858_v11 = vmul.f32 %v852_v0, %v2259_v51 }
 0x548   : > { %v860_v12 = vpop.permute.xlu1 %859  ;;  %v862_v39 = vpop.permute.xlu0 %861  ;;  %v1381_v58 = vpack.c.bf16 %v858_v11, %v856_v2  ;;  %v1383_v60 = vpack.c.bf16 %v857_v38, %v855_v34 }
 0x54a   : > { %1382 = vmatprep.subr.bf16.mxu1 %v1381_v58 }
 0x54b   : > { %1384 = vmatpush1.bf16.msra.mxu1 %v1383_v60 }
 0x54c   : > { %v864_v42 = vpop.permute.xlu1 %863  ;;  %v866_v43 = vpop.permute.xlu0 %865 }
 0x54d   : > { %v867_v44 = vsel %vm446_vm4, %v860_v12, %v864_v42  ;;  %v869_v45 = vsel %vm446_vm4, %v864_v42, %v860_v12  ;;  %v868_v49 = vsel %vm446_vm4, %v862_v39, %v866_v43  ;;  %v870_v50 = vsel %vm446_vm4, %v866_v43, %v862_v39 }
 0x54e   : > { %v871_v51 = vmul.f32 %v869_v45, %v2275_v7  ;;  %v872_v53 = vmul.f32 %v867_v44, %v2278_v8  ;;  %v873_v54 = vmul.f32 %v870_v50, %v2275_v7  ;;  %v874_v55 = vmul.f32 %v868_v49, %v2278_v8 }
 0x550   : > { %v876_v56 = vpop.permute.xlu1 %875  ;;  %v878_v57 = vpop.permute.xlu0 %877  ;;  %v1385_v59 = vpack.c.bf16 %v874_v55, %v872_v53  ;;  %v1387_v61 = vpack.c.bf16 %v873_v54, %v871_v51  ;;  %v939_v53 = vld [vmem:[#allocation8] sm:$0xff]  ;;  %v942_v54 = vld [vmem:[#allocation8 + $0x18] sm:$0xff]  ;;  %v941_v55 = vld [vmem:[#allocation8 + $0x10] sm:$0xff] }
 0x552   : > { %1386 = vmatprep.subr.bf16.mxu1 %v1385_v59 }
 0x553   : > { %1388 = vmatpush1.bf16.msra.mxu1 %v1387_v61 }
 0x554   : > { %v880_v62 = vpop.permute.xlu1 %879  ;;  %1390 = vmatprep.subr.bf16.mxu1 %v1389_v48  ;;  %v882_v63 = vpop.permute.xlu0 %881 }
 0x555   : > { %v883_v4 = vsel %vm476_vm5, %v876_v56, %v880_v62  ;;  %v885_v7 = vsel %vm476_vm5, %v880_v62, %v876_v56  ;;  %v884_v8 = vsel %vm476_vm5, %v878_v57, %v882_v63  ;;  %v886_v9 = vsel %vm476_vm5, %v882_v63, %v878_v57 }
 0x556   : > { %v887_v13 = vmul.f32 %v883_v4, %v2296_v30  ;;  %v888_v14 = vmul.f32 %v885_v7, %v2299_v31  ;;  %v889_v1 = vmul.f32 %v884_v8, %v2296_v30  ;;  %v890_v41 = vmul.f32 %v886_v9, %v2299_v31 }
 0x557   : > { %1392 = vmatpush1.bf16.msra.mxu1 %v1391_v52 }
 0x558   : > { %v892_v48 = vpop.permute.xlu1 %891  ;;  %v894_v15 = vpop.permute.xlu0 %893  ;;  %v1393_v18 = vpack.c.bf16 %v890_v41, %v888_v14  ;;  %v1395_v19 = vpack.c.bf16 %v889_v1, %v887_v13 }
 0x55a   : > { %1394 = vmatprep.subr.bf16.mxu1 %v1393_v18 }
 0x55b   : > { %1396 = vmatpush1.bf16.msra.mxu1 %v1395_v19 }
 0x55c   : > { %v896_v16 = vpop.permute.xlu1 %895  ;;  %v898_v17 = vpop.permute.xlu0 %897 }
 0x55d   : > { %v899_v20 = vsel %vm506_vm6, %v892_v48, %v896_v16  ;;  %v901_v30 = vsel %vm506_vm6, %v896_v16, %v892_v48  ;;  %v900_v31 = vsel %vm506_vm6, %v894_v15, %v898_v17  ;;  %v902_v40 = vsel %vm506_vm6, %v898_v17, %v894_v15 }
 0x55e   : > { %v903_v3 = vmul.f32 %v899_v20, %v2317_v46  ;;  %v904_v52 = vmul.f32 %v901_v30, %v2320_v47  ;;  %v905_v21 = vmul.f32 %v900_v31, %v2317_v46  ;;  %v906_v22 = vmul.f32 %v902_v40, %v2320_v47 }
 0x560   : > { %v908_v23 = vpop.permute.xlu1 %907  ;;  %v910_v24 = vpop.permute.xlu0 %909  ;;  %v1397_v25 = vpack.c.bf16 %v906_v22, %v904_v52  ;;  %v1399_v26 = vpack.c.bf16 %v905_v21, %v903_v3 }
 0x562   : > { %1398 = vmatprep.subr.bf16.mxu1 %v1397_v25 }
 0x563   : > { %1400 = vmatpush1.bf16.msra.mxu1 %v1399_v26 }
 0x564   : > { %v912_v27 = vpop.permute.xlu1 %911  ;;  %v914_v28 = vpop.permute.xlu0 %913 }
 0x565   : > { %v915_v35 = vsel %vm536_vm7, %v908_v23, %v912_v27  ;;  %v917_v36 = vsel %vm536_vm7, %v912_v27, %v908_v23  ;;  %v916_v37 = vsel %vm536_vm7, %v910_v24, %v914_v28  ;;  %v918_v46 = vsel %vm536_vm7, %v914_v28, %v910_v24 }
 0x566   : > { %v919_v47 = vmul.f32 %v915_v35, %v2336_v5  ;;  %v920_v0 = vmul.f32 %v917_v36, %v2339_v6  ;;  %v921_v33 = vmul.f32 %v916_v37, %v2336_v5  ;;  %v922_v34 = vmul.f32 %v918_v46, %v2339_v6 }
 0x568   : > { %v924_v2 = vpop.permute.xlu1 %923  ;;  %v926_v38 = vpop.permute.xlu0 %925  ;;  %v1401_v11 = vpack.c.bf16 %v922_v34, %v920_v0  ;;  %v1403_v12 = vpack.c.bf16 %v921_v33, %v919_v47 }
 0x56a   : > { %1402 = vmatprep.subr.bf16.mxu1 %v1401_v11 }
 0x56b   : > { %1404 = vmatpush1.bf16.msra.mxu1 %v1403_v12 }
 0x56c   : > { %v928_v39 = vpop.permute.xlu1 %927  ;;  %v930_v58 = vpop.permute.xlu0 %929 }
 0x56d   : > { %v931_v60 = vsel %vm566_vm8, %v924_v2, %v928_v39  ;;  %v933_v42 = vsel %vm566_vm8, %v928_v39, %v924_v2  ;;  %v932_v43 = vsel %vm566_vm8, %v926_v38, %v930_v58  ;;  %v934_v5 = vsel %vm566_vm8, %v930_v58, %v926_v38 }
 0x56e   : > { %v935_v6 = vmul.f32 %v931_v60, %v2355_v29  ;;  %v936_v44 = vmul.f32 %v933_v42, %v2358_v32  ;;  %v937_v45 = vmul.f32 %v932_v43, %v2355_v29  ;;  %v938_v49 = vmul.f32 %v934_v5, %v2358_v32 }
 0x570   : > { %v1405_v50 = vpack.c.bf16 %v938_v49, %v936_v44  ;;  %v1407_v51 = vpack.c.bf16 %v937_v45, %v935_v6  ;;  %v1055_v44 = vld [vmem:[#allocation11 + $0x10] sm:$0xff] }
 0x572   : > { %1406 = vmatprep.subr.bf16.mxu1 %v1405_v50 }
 0x573   : > { %1408 = vmatpush1.bf16.msra.mxu1 %v1407_v51 }
 0x576   : > { %1026 = vmatmul.mubr.f32.vlgmr.msra.gmra.mrb[0].mxu1 %v939_v53 }
 0x577   : > { %1329 = vmatprep.mubr.msk.f32.mxu1 %vm604_vm0, %v942_v54 }
 0x57a   : > { %1032 = vmatmul.mubr.f32.gmra.mrb[2].mxu1 %v941_v55  ;;  %v1056_v55 = vld [vmem:[#allocation11 + $0x18] sm:$0xff] }
 0x57d   : > { %v948_v10 = vpop.permute.xlu1 %947 }
 0x581   : > { %v953_v32 = vpop.permute.xlu1 %952 }
 0x649   : > { %v1027_v56 = vpop.f32.mrb[0].mxu1 }
 0x64a   : > { %v2588_v57 = vadd.f32 %v1027_v56, %v948_v10  ;;  %v1029_v59 = vpop.f32.mrb[1].mxu1 }
 0x64b   : > { %v2590_v61 = vadd.f32 %v1029_v59, %v948_v10 }
 0x64c   : > { %v1044_v29 = vmul.f32 %v2588_v57, %v2588_v57 }
 0x64d   : > { %v1033_v62 = vpop.f32.mrb[2].mxu1  ;;  %v1038_v63 = vadd.f32 %v2590_v61, %v2588_v57  ;;  %v1045_v4 = vmul.f32 %v2590_v61, %v2590_v61 }
 0x64e   : > { %v2598_v7 = vadd.f32 %v1033_v62, %v953_v32  ;;  %v1035_v8 = vpop.f32.mrb[3].mxu1 }
 0x64f   : > { %v2600_v9 = vadd.f32 %v1035_v8, %v953_v32  ;;  %1039 = vadd.xlane.f32.xlu0 %v1038_v63  ;;  %v1048_v13 = vadd.f32 %v1045_v4, %v1044_v29  ;;  %v1058_v29 = vld [vmem:[#allocation11 + $0x20] sm:$0xff]  ;;  %v1059_v32 = vld [vmem:[#allocation11 + $0x28] sm:$0xff] }
 0x650   : > { %v1046_v1 = vmul.f32 %v2598_v7, %v2598_v7 }
 0x651   : > { %1049 = vadd.xlane.f32.xlu1 %v1048_v13  ;;  %v1041_v14 = vadd.f32 %v2600_v9, %v2598_v7  ;;  %v1047_v41 = vmul.f32 %v2600_v9, %v2600_v9 }
 0x653   : > { %1042 = vadd.xlane.f32.xlu0 %v1041_v14  ;;  %v1051_v48 = vadd.f32 %v1047_v41, %v1046_v1 }
 0x657   : > { %1052 = vadd.xlane.f32.xlu0 %v1051_v48 }
 0x6dc   : > { %v1040_v15 = vpop.xlane.xlu0 %1039 }
 0x6dd   : > { %v1060_v18 = vsel %vm710_vm9, %v1040_v15, 0.0 }
 0x6de   : > { %v1050_v19 = vpop.xlane.xlu1 %1049  ;;  %1061 = vadd.xlane.f32.xlu0 %v1060_v18 }
 0x6df   : > { %v1071_v16 = vsel %vm710_vm9, %v1050_v19, 0.0 }
 0x6e0   : > { %1072 = vadd.xlane.f32.xlu1 %v1071_v16  ;;  %v1043_v17 = vpop.xlane.xlu0 %1042 }
 0x6e1   : > { %v1094_v20 = vsel %vm710_vm9, %v1043_v17, 0.0 }
 0x6e2   : > { %1095 = vadd.xlane.f32.xlu0 %v1094_v20 }
 0x6e4   : > { %v1053_v30 = vpop.xlane.xlu0 %1052 }
 0x6e5   : > { %v1105_v31 = vsel %vm710_vm9, %v1053_v30, 0.0 }
 0x6e6   : > { %1106 = vadd.xlane.f32.xlu1 %v1105_v31 }
 0x76b   : > { %v1062_v40 = vpop.xlane.xlu0 %1061 }
 0x76c   : > { %v1063_v3 = vrot.slane %v1062_v40, 4 }
 0x76d   : > { %v1073_v52 = vpop.xlane.xlu1 %1072 }
 0x76e   : > { %v1064_v21 = vadd.f32 %v1063_v3, %v1062_v40  ;;  %v1074_v22 = vrot.slane %v1073_v52, 4 }
 0x76f   : > { %v1096_v46 = vpop.xlane.xlu0 %1095 }
 0x770   : > { %v1065_v23 = vrot.slane %v1064_v21, 2  ;;  %v1075_v24 = vadd.f32 %v1074_v22, %v1073_v52  ;;  %v1097_v0 = vrot.slane %v1096_v46, 4  ;;  %v1557_v52 = vld [vmem:[%s2115_s15 + $0x10] sm:$0xff]  ;;  %v1558_v22 = vld [vmem:[%s2115_s15 + $0x18] sm:$0xff] }
 0x772   : > { %v1076_v25 = vrot.slane %v1075_v24, 2  ;;  %v1066_v26 = vadd.f32 %v1065_v23, %v1064_v21  ;;  %v1098_v34 = vadd.f32 %v1097_v0, %v1096_v46 }
 0x773   : > { %v1107_v47 = vpop.xlane.xlu1 %1106 }
 0x774   : > { %v1067_v27 = vrot.slane %v1066_v26, 1  ;;  %v1077_v28 = vadd.f32 %v1076_v25, %v1075_v24  ;;  %v1108_v33 = vrot.slane %v1107_v47, 4  ;;  %v1099_v38 = vrot.slane %v1098_v34, 2 }
 0x776   : > { %v1068_v35 = vadd.f32 %v1067_v27, %v1066_v26  ;;  %v1078_v36 = vrot.slane %v1077_v28, 1  ;;  %v1109_v2 = vadd.f32 %v1108_v33, %v1107_v47  ;;  %v1100_v39 = vadd.f32 %v1099_v38, %v1098_v34 }
 0x778   : > { %1421 = vpush %v1068_v35  ;;  %v1079_v37 = vadd.f32 %v1078_v36, %v1077_v28  ;;  %v1110_v11 = vrot.slane %v1109_v2, 2  ;;  %v1101_v60 = vrot.slane %v1100_v39, 1 }
 0x77a   : > { %1423 = vpush %v1079_v37  ;;  %v1111_v58 = vadd.f32 %v1110_v11, %v1109_v2  ;;  %v1102_v5 = vadd.f32 %v1101_v60, %v1100_v39 }
 0x77c   : > { %v1112_v42 = vrot.slane %v1111_v58, 1 }
 0x77e   : > { %v1113_v6 = vadd.f32 %v1112_v42, %v1111_v58 }
 0x7a9   : > { %s1422_s16 = spop %1421 }
 0x7aa   : > { %s2612_s10 = smul.f32 0.00048828125, %s1422_s16 }
 0x7ab   : > { %s1424_s17 = spop %1423 }
 0x7ac   : > { %s1082_s9 = smul.f32 %s2612_s10, %s2612_s10  ;;  %v1091_v50 = vstv %s2612_s10 }
 0x7ad   : > { %s1081_s14 = smul.f32 0.00048828125, %s1424_s17 }
 0x7af   : > { %s1083_s20 = ssub.f32 %s1081_s14, %s1082_s9 }
 0x7b1   : > { %s1084_s28 = smax.f32 %s1828_s26, %s1083_s20 }
 0x7b2   : > { %s1085_s8 = sadd.f32 1e-05, %s1084_s28 }
 0x7b4   : > { %v1086_v12 = vstv %s1085_s8 }
 0x7b5   : > { %1551 = vrsqrt.f32 %v1086_v12 }
 0x7bf   : > { %v1552_v43 = vpop.eup %1551 }
 0x7c0   : > { %1425 = vpush %v1552_v43 }
 0x7c1   : > { %1427 = vpush %v1102_v5 }
 0x7c2   : > { %1429 = vpush %v1113_v6 }
 0x7f1   : > { %s1426_s11 = spop %1425 }
 0x7f2   : > { %v1089_v45 = vstv %s1426_s11  ;;  %s1428_s12 = spop %1427 }
 0x7f3   : > { %v1090_v49 = vmul.f32 %v1089_v45, %v1055_v44  ;;  %s1104_s30 = smul.f32 0.00048828125, %s1428_s12  ;;  %s1430_s16 = spop %1429 }
 0x7f4   : > { %s1115_s17 = smul.f32 0.00048828125, %s1430_s16  ;;  %s1336_s12 = sshll.u32 %s1887_s27, 9 }
 0x7f5   : > { %v1092_v51 = vmul.f32 %v1091_v50, %v1090_v49  ;;  %s1116_s9 = smul.f32 %s1104_s30, %s1104_s30  ;;  %1130 = vperm.xlu0 %1545, %v1090_v49   ;;  %v1125_v59 = vstv %s1104_s30  ;;  %s2635_s16 = scalar_lea.hbm %s2686_s6, %s1336_s12 }
 0x7f7   : > { %s1117_s14 = ssub.f32 %s1115_s17, %s1116_s9  ;;  %v1093_v63 = vsub.f32 %v1058_v29, %v1092_v51  ;;  %s1829_s9 = smov [#allocation13]  }
 0x7f9   : > { %s1118_s20 = smax.f32 %s1828_s26, %s1117_s14  ;;  %s2727_s26 = sshll.u32 %s2109_s25, 5 }
 0x7fa   : > { %s1119_s28 = sadd.f32 1e-05, %s1118_s20  ;;  %s342_s10 = scalar_lea.vmem [#allocation13], %s2727_s26 }
 0x7fb   : > { %s1186_s11 = sshll.u32 %s342_s10, 4  ;;  %s1733_s14 = sshll.u32 %s1829_s9, 4  ;;  %s2630_s11 = int_to_ptr.vmem [resolvable:$true] %s1186_s11  ;;  %s1734_s14 = int_to_ptr.vmem [resolvable:$false] %s1733_s14 }
 0x7fc   : > { %v1120_v53 = vstv %s1119_s28  ;;  %s1729_s17 = scalar_lea.vmem %s2630_s11, 512  ;;  %s1735_s20 = scalar_lea.vmem %s1734_s14, 1024 }
 0x7fd   : > { %1553 = vrsqrt.f32 %v1120_v53  ;;  %p1730_p7 = scmp.ne.s32.totalorder %s2630_s11, %s1729_s17  ;;  %p1736_p13 = scmp.lt.s32.totalorder %s2630_s11, %s1734_s14 }
 0x7fe   : > { %p1737_p0 = scmp.lt.s32.totalorder %s1735_s20, %s1729_s17 }
 0x7ff   : > { %p1731_p12 = pnand %p1730_p7, %p2728_p4 }
 0x800   : > { %p1738_p2 = por %p1737_p0, %p1736_p13 }
 0x801   : > { %p1732_p1 = pneg %p1731_p12 }
 0x803   : > { %p1739_p8 = pnand %p1738_p2, %p1732_p1 }
 0x807   : > { %v1554_v54 = vpop.eup %1553 }
 0x808   : > { %1431 = vpush %v1554_v54 }
 0x839   : > { %s1432_s8 = spop %1431 }
 0x83a   : > { %v1123_v10 = vstv %s1432_s8 }
 0x83b   : > { %v1124_v56 = vmul.f32 %v1123_v10, %v1056_v55 }
 0x83d   : > { %v1126_v62 = vmul.f32 %v1125_v59, %v1124_v56  ;;  %1135 = vperm.xlu1 %1546, %v1124_v56  }
 0x83f   : > { %v1127_v4 = vsub.f32 %v1059_v32, %v1126_v62 }
 0x841   : > { %1144 = vperm.xlu1 %1546, %v1093_v63   ;;  %1149 = vperm.xlu0 %1545, %v1127_v4  }
 0x874   : > { %v1131_v8 = vpop.permute.xlu0 %1130 }
 0x875   : > { %v1138_v14 = vmul.f32 %v1131_v8, %v2588_v57  ;;  %v1139_v1 = vmul.f32 %v1131_v8, %v2590_v61 }
 0x8bc   : > { %v1136_v13 = vpop.permute.xlu1 %1135 }
 0x8bd   : > { %v1140_v41 = vmul.f32 %v1136_v13, %v2598_v7  ;;  %v1141_v48 = vmul.f32 %v1136_v13, %v2600_v9  ;;  %v1555_v7 = vld [vmem:[%s2115_s15] sm:$0xff]  ;;  %v1556_v9 = vld [vmem:[%s2115_s15 + $0x8] sm:$0xff]  ;;  %s1173_s15 = scalar_lea.sflag [#allocation4], %s2109_s25 }
 0x8c0   : > { %v1145_v15 = vpop.permute.xlu1 %1144  ;;  %v1150_v18 = vpop.permute.xlu0 %1149 }
 0x8c1   : > { %v1152_v19 = vadd.f32 %v1145_v15, %v1138_v14  ;;  %v1153_v16 = vadd.f32 %v1145_v15, %v1139_v1  ;;  %v1154_v17 = vadd.f32 %v1150_v18, %v1140_v41  ;;  %v1155_v20 = vadd.f32 %v1150_v18, %v1141_v48 }
 0x8c3   : > { %v1156_v57 = vmax.f32 %v1152_v19, 0.0  ;;  %v1157_v30 = vmax.f32 %v1153_v16, 0.0  ;;  %v1158_v61 = vmax.f32 %v1154_v17, 0.0  ;;  %v1159_v31 = vmax.f32 %v1155_v20, 0.0 }
 0x8c5   : > { %v1160_v40 = vadd.f32 %v1555_v7, %v1156_v57  ;;  %v1161_v3 = vadd.f32 %v1556_v9, %v1157_v30  ;;  %v1162_v21 = vadd.f32 %v1557_v52, %v1158_v61  ;;  %v1163_v23 = vadd.f32 %v1558_v22, %v1159_v31 }
 0x8c7   : > { %v1164_v24 = vmax.f32 %v1160_v40, 0.0  ;;  %v1165_v25 = vmax.f32 %v1161_v3, 0.0  ;;  %v1166_v26 = vmax.f32 %v1162_v21, 0.0  ;;  %v1167_v27 = vmax.f32 %v1163_v23, 0.0 }
 0x8c9   : > { %1168 = vst [vmem:[%s342_s10] sm:$0xff] %v1164_v24  ;;  %1169 = vst [vmem:[%s342_s10 + $0x8] sm:$0xff] %v1165_v25 }
 0x8ca   : > { %1170 = vst [vmem:[%s342_s10 + $0x10] sm:$0xff] %v1166_v26  ;;  %1171 = vst [vmem:[%s342_s10 + $0x18] sm:$0xff] %v1167_v27 }
 0x8cb   : > { %1742 = shalt.err (!%p1739_p8)
}
 0x8cc   : > { %s1743_s28 = scalar_lea.hbm %s2635_s16, 512  ;;  %s1747_s10 = scalar_lea.hbm %s2686_s6, 1024 }
 0x8cd   : > { %p1744_p6 = scmp.ne.s32.totalorder %s2635_s16, %s1743_s28  ;;  %p1748_p3 = scmp.lt.u32.totalorder %s2635_s16, %s2686_s6 }
 0x8ce   : > { %p1749_p5 = scmp.lt.u32.totalorder %s1747_s10, %s1743_s28  ;;  %p1751_p7 = scmp.lt.u32.totalorder %s1743_s28, %s2635_s16 }
 0x8cf   : > { %p1745_p10 = pnand %p1744_p6, %p2728_p4 }
 0x8d0   : > { %p1750_p9 = por %p1749_p5, %p1748_p3 }
 0x8d1   : > { %p1746_p11 = pneg %p1745_p10 }
 0x8d2   : > { %p1752_p12 = por %p1751_p7, %p1750_p9 }
 0x8d4   : > { %p1753_p1 = pnand %p1752_p12, %p1746_p11 }
 0x8d6   : > { %1756 = shalt.err (!%p1753_p1)
}
 0x8d7   : > { %s1830_s30 = smov 256  }
 0x8d8   : > { %1455 = dma.vmem_to_hbm [thread:$0]  (%p2728_p4), %s2630_s11, 512, %s2635_s16, %s1173_s15, %s1830_s30, %s1830_s30, %s2720_s19  }
 0x8d9 PF: > { %s1201_s17 = sand.u32 1, %s1795_s21   ;;  %p2729_p13 = scmp.ne.s32.totalorder %s2711_s18, 0 }
 0x8da   : > { %p2730_p0 = scmp.ge.s32.totalorder %s1807_s24, 2  ;;  %s1202_s9 = scalar_lea.sflag [#allocation4], %s1201_s17 }
 0x8dc   : > { %p1478_p2 = pnand %p2730_p0, %p2729_p13 }
 0x8de   : > { %1790 = dma.done.wait (!%p1478_p2), %s1202_s9, 512  }
 0x8df   : > { %1792 = vsyncadd (!%p1478_p2), %s1202_s9, 4294966784  ;;  %p22_p8 = scmp.ge.s32.totalorder %s2033_s7, 4   ;;  %s2731_s21 = smov %s1799_s22 }
 0x8e0   : > { %s2732_s22 = smov %s1803_s23  ;;  %s2733_s23 = smov %s2045_s29 }
 0x8e1   : > { %s2734_s24 = smov %s2033_s7  ;;  %24 = sbr.rel (!%p22_p8) target bundleno = 8 (0x8), region = 120 }
 0x8e8   :  { %1207 = vsyncpa [#allocation3], 1 }
 0x8e9   :  { %1209 = vsyncpa [#allocation3 + $0x1], 1 }
 0x8ea   :  { %1210 = vsyncpa [#allocation6], 1 }
 0x8eb   :  { %1211 = vsyncpa [#allocation9], 1 }
 0x8ec   :  { %1212 = vsyncpa [#allocation12], 1 }
 0x8ed   :  { %1213 = vsyncpa [#allocation4], 1 }
 0x8ee   :  { %1215 = vsyncpa [#allocation4 + $0x1], 1 }

</bundles_post_ra>
